<compile_context>
chip_gen: v5e
topology: v5e:2x2
jax: 0.10.0
libtpu: 0.0.40
codegen_flags: <defaults>
</compile_context>

<pallas_src>
import functools

import jax
import jax.numpy as jnp
from jax.experimental import pallas as pl
from jax.experimental.pallas import tpu as pltpu


def _xlm_roberta_output_kernel(x_ref, w_ref, b_ref, res_ref, g_ref, beta_ref,
                               o_ref, *, eps):
    """dense(intermediate->hidden) + bias + residual + LayerNorm, fused.

    Grid: (S // tm,).  The whole weight matrix is resident in VMEM (constant
    index_map), so each grid step is one MXU pass over the full reduction dim
    followed by the LayerNorm epilogue — no accumulator scratch needed.
    """
    # Cast the streamed f32 x tile to the matmul dtype in-kernel (VPU, hidden
    # under the MXU); avoids a separate XLA astype that round-trips HBM.
    x = x_ref[...].astype(w_ref.dtype)

    # bf16 x bf16 -> f32 on the MXU, full reduction in one pass.
    h = jnp.dot(x, w_ref[...], preferred_element_type=jnp.float32)

    # Bias + residual in f32.
    h = h + b_ref[...] + res_ref[...].astype(jnp.float32)

    # LayerNorm over hidden, numerically safe two-pass variance.
    mean = jnp.mean(h, axis=-1, keepdims=True)
    centered = h - mean
    var = jnp.mean(centered * centered, axis=-1, keepdims=True)
    hn = centered * jax.lax.rsqrt(var + eps)

    o_ref[...] = (hn * g_ref[...] + beta_ref[...]).astype(o_ref.dtype)


def xlm_roberta_output(hidden_states, input_tensor, w_dense, b_dense,
                       ln_gamma, ln_beta, *, eps=1e-5, tm=256,
                       compute_dtype=jnp.bfloat16, out_dtype=jnp.float32):
    """hidden_states: [S, I] ; input_tensor: [S, H] ; w_dense: [I, H] (pre-transposed)."""
    S, I = hidden_states.shape
    I_w, H = w_dense.shape
    assert I == I_w, (I, I_w)
    assert input_tensor.shape == (S, H), (input_tensor.shape, (S, H))

    # Row-tile selection: big enough to feed the 256-wide MXU on v6e/v7x, but keep
    # at least 2 row blocks so the "parallel" S axis can shard across v7x's 2 TCs.
    tm = min(tm, S)
    if S // tm < 2 and tm >= 256 and S % (tm // 2) == 0:
        tm //= 2
    assert S % tm == 0, (S, tm)
    # TODO(synk): arbitrary (non-tile-multiple) sequence lengths need pl.cdiv grid
    # plus row masking or caller-side padding.

    # W converted to the matmul dtype once (in production: pre-store as bf16).
    w = w_dense.astype(compute_dtype)
    b = b_dense.reshape(1, H).astype(jnp.float32)
    g = ln_gamma.reshape(1, H).astype(jnp.float32)
    beta = ln_beta.reshape(1, H).astype(jnp.float32)

    kernel = functools.partial(_xlm_roberta_output_kernel, eps=float(eps))

    return pl.pallas_call(
        kernel,
        out_shape=jax.ShapeDtypeStruct((S, H), out_dtype),
        grid=(S // tm,),
        in_specs=[
            pl.BlockSpec((tm, I), lambda i: (i, 0)),   # x row tile (streamed)
            pl.BlockSpec((I, H), lambda i: (0, 0)),    # W: whole array, resident in VMEM
            pl.BlockSpec((1, H), lambda i: (0, 0)),    # bias (constant)
            pl.BlockSpec((tm, H), lambda i: (i, 0)),   # residual row tile
            pl.BlockSpec((1, H), lambda i: (0, 0)),    # LN gamma
            pl.BlockSpec((1, H), lambda i: (0, 0)),    # LN beta
        ],
        out_specs=pl.BlockSpec((tm, H), lambda i: (i, 0)),
        compiler_params=pltpu.CompilerParams(
            dimension_semantics=("parallel",),
            vmem_limit_bytes=48 * 1024 * 1024,   # resident W + tiles stay well under 64 MiB (v7x)
        ),
    )(hidden_states, w, b, input_tensor, g, beta)


def _reference(hidden_states, input_tensor, w_dense, b_dense, ln_gamma, ln_beta,
               eps, compute_dtype):
    # Same bf16 matmul / f32 accumulate as the kernel; LN in f32.
    h = jnp.dot(hidden_states.astype(compute_dtype),
                w_dense.astype(compute_dtype),
                preferred_element_type=jnp.float32)
    h = h + b_dense + input_tensor
    mean = jnp.mean(h, axis=-1, keepdims=True)
    var = jnp.mean((h - mean) ** 2, axis=-1, keepdims=True)
    return (h - mean) / jnp.sqrt(var + eps) * ln_gamma + ln_beta


if __name__ == "__main__":
    # Small, tile-friendly shapes: seq=256, intermediate=512, hidden=256.
    SEQ, INTER, HIDDEN = 256, 512, 256
    key = jax.random.PRNGKey(0)
    k1, k2, k3, k4 = jax.random.split(key, 4)

    hidden_states = jax.random.normal(k1, (SEQ, INTER), dtype=jnp.float32)
    input_tensor = jax.random.normal(k2, (SEQ, HIDDEN), dtype=jnp.float32)
    w_dense = jax.random.normal(k3, (INTER, HIDDEN), dtype=jnp.float32) * 0.02
    b_dense = jax.random.normal(k4, (HIDDEN,), dtype=jnp.float32) * 0.02
    ln_gamma = jnp.ones((HIDDEN,), dtype=jnp.float32)
    ln_beta = jnp.zeros((HIDDEN,), dtype=jnp.float32)

    out = xlm_roberta_output(hidden_states, input_tensor, w_dense, b_dense,
                             ln_gamma, ln_beta, eps=1e-5)
    out = jax.block_until_ready(out)

    ref = _reference(hidden_states, input_tensor, w_dense, b_dense,
                     ln_gamma, ln_beta, 1e-5, jnp.bfloat16)
    assert out.shape == (SEQ, HIDDEN)
    assert jnp.allclose(out, ref, atol=3e-3, rtol=3e-3), \
        f"max abs diff {float(jnp.max(jnp.abs(out - ref)))}"

    print("KERNEL_OK")
</pallas_src>

<mosaic_0001>
module attributes {stable_mosaic.version = 11 : i64} {
  func.func @_xlm_roberta_output_kernel(%arg0: i32, %arg1: memref<128x512xf32, #tpu.memory_space<vmem>>, %arg2: memref<512x256xbf16, #tpu.memory_space<vmem>>, %arg3: memref<1x256xf32, #tpu.memory_space<vmem>>, %arg4: memref<128x256xf32, #tpu.memory_space<vmem>>, %arg5: memref<1x256xf32, #tpu.memory_space<vmem>>, %arg6: memref<1x256xf32, #tpu.memory_space<vmem>>, %arg7: memref<128x256xf32, #tpu.memory_space<vmem>>) attributes {dimension_semantics = [#tpu.dimension_semantics<parallel>], iteration_bounds = array<i64: 2>, scalar_prefetch = 0 : i64, scratch_operands = 0 : i64, tpu.core_type = #tpu.core_type<tc>, window_params = [{transform_indices = @transform_0, window_bounds = array<i64: 128, 512>}, {pipeline_mode = #tpu.pipeline_mode<synchronous>, transform_indices = @transform_1, window_bounds = array<i64: 512, 256>}, {pipeline_mode = #tpu.pipeline_mode<synchronous>, transform_indices = @transform_2, window_bounds = array<i64: 1, 256>}, {transform_indices = @transform_3, window_bounds = array<i64: 128, 256>}, {pipeline_mode = #tpu.pipeline_mode<synchronous>, transform_indices = @transform_4, window_bounds = array<i64: 1, 256>}, {pipeline_mode = #tpu.pipeline_mode<synchronous>, transform_indices = @transform_5, window_bounds = array<i64: 1, 256>}, {transform_indices = @transform_6, window_bounds = array<i64: 128, 256>}]} {
    %c0 = arith.constant 0 : index
    %c0_0 = arith.constant 0 : index
    %0 = vector.load %arg1[%c0, %c0_0] : memref<128x512xf32, #tpu.memory_space<vmem>>, vector<128x512xf32>
    %1 = arith.truncf %0 : vector<128x512xf32> to vector<128x512xbf16>
    %c0_1 = arith.constant 0 : index
    %c0_2 = arith.constant 0 : index
    %2 = vector.load %arg2[%c0_1, %c0_2] : memref<512x256xbf16, #tpu.memory_space<vmem>>, vector<512x256xbf16>
    %cst = arith.constant dense<0.000000e+00> : vector<128x256xf32>
    %3 = tpu.matmul %1, %2, %cst {dimension_numbers = #tpu.dot_dimension_numbers<[1], [0], [0], [1], [0, 0, 1, 1], [], []>} : vector<128x512xbf16>, vector<512x256xbf16>, vector<128x256xf32> -> vector<128x256xf32>
    %c0_3 = arith.constant 0 : index
    %c0_4 = arith.constant 0 : index
    %4 = vector.load %arg3[%c0_3, %c0_4] : memref<1x256xf32, #tpu.memory_space<vmem>>, vector<1x256xf32>
    %5 = vector.broadcast %4 : vector<1x256xf32> to vector<128x256xf32>
    %6 = arith.addf %3, %5 : vector<128x256xf32>
    %c0_5 = arith.constant 0 : index
    %c0_6 = arith.constant 0 : index
    %7 = vector.load %arg4[%c0_5, %c0_6] : memref<128x256xf32, #tpu.memory_space<vmem>>, vector<128x256xf32>
    %8 = arith.addf %6, %7 : vector<128x256xf32>
    %cst_7 = arith.constant dense<0.000000e+00> : vector<128xf32>
    %9 = vector.multi_reduction <add>, %8, %cst_7 [1] : vector<128x256xf32> to vector<128xf32>
    %10 = vector.shape_cast %9 : vector<128xf32> to vector<128x1xf32>
    %cst_8 = arith.constant 2.560000e+02 : f32
    %11 = vector.broadcast %cst_8 : f32 to vector<128x1xf32>
    %12 = arith.divf %10, %11 : vector<128x1xf32>
    %13 = vector.broadcast %12 : vector<128x1xf32> to vector<128x256xf32>
    %14 = arith.subf %8, %13 : vector<128x256xf32>
    %15 = arith.mulf %14, %14 : vector<128x256xf32>
    %cst_9 = arith.constant dense<0.000000e+00> : vector<128xf32>
    %16 = vector.multi_reduction <add>, %15, %cst_9 [1] : vector<128x256xf32> to vector<128xf32>
    %17 = vector.shape_cast %16 : vector<128xf32> to vector<128x1xf32>
    %cst_10 = arith.constant 2.560000e+02 : f32
    %18 = vector.broadcast %cst_10 : f32 to vector<128x1xf32>
    %19 = arith.divf %17, %18 : vector<128x1xf32>
    %cst_11 = arith.constant 9.99999974E-6 : f32
    %20 = vector.broadcast %cst_11 : f32 to vector<128x1xf32>
    %21 = arith.addf %19, %20 : vector<128x1xf32>
    %22 = math.rsqrt %21 : vector<128x1xf32>
    %23 = vector.broadcast %22 : vector<128x1xf32> to vector<128x256xf32>
    %24 = arith.mulf %14, %23 : vector<128x256xf32>
    %c0_12 = arith.constant 0 : index
    %c0_13 = arith.constant 0 : index
    %25 = vector.load %arg5[%c0_12, %c0_13] : memref<1x256xf32, #tpu.memory_space<vmem>>, vector<1x256xf32>
    %26 = vector.broadcast %25 : vector<1x256xf32> to vector<128x256xf32>
    %27 = arith.mulf %24, %26 : vector<128x256xf32>
    %c0_14 = arith.constant 0 : index
    %c0_15 = arith.constant 0 : index
    %28 = vector.load %arg6[%c0_14, %c0_15] : memref<1x256xf32, #tpu.memory_space<vmem>>, vector<1x256xf32>
    %29 = vector.broadcast %28 : vector<1x256xf32> to vector<128x256xf32>
    %30 = arith.addf %27, %29 : vector<128x256xf32>
    %c0_16 = arith.constant 0 : index
    %c0_17 = arith.constant 0 : index
    %31 = vector.load %arg7[%c0_16, %c0_17] : memref<128x256xf32, #tpu.memory_space<vmem>>, vector<128x256xf32>
    tpu.vector_store %arg7[%c0_16, %c0_17], %30 {strides = array<i32>} : memref<128x256xf32, #tpu.memory_space<vmem>>, vector<128x256xf32>,
    return
  }
  func.func @transform_0(%arg0: i32) -> (i32, i32) {
    %c0_i32 = arith.constant 0 : i32
    %c0_i32_0 = arith.constant 0 : i32
    return %arg0, %c0_i32 : i32, i32
  }
  func.func @transform_1(%arg0: i32) -> (i32, i32) {
    %c0_i32 = arith.constant 0 : i32
    %c0_i32_0 = arith.constant 0 : i32
    %c0_i32_1 = arith.constant 0 : i32
    return %c0_i32, %c0_i32_0 : i32, i32
  }
  func.func @transform_2(%arg0: i32) -> (i32, i32) {
    %c0_i32 = arith.constant 0 : i32
    %c0_i32_0 = arith.constant 0 : i32
    %c0_i32_1 = arith.constant 0 : i32
    return %c0_i32, %c0_i32_0 : i32, i32
  }
  func.func @transform_3(%arg0: i32) -> (i32, i32) {
    %c0_i32 = arith.constant 0 : i32
    %c0_i32_0 = arith.constant 0 : i32
    return %arg0, %c0_i32 : i32, i32
  }
  func.func @transform_4(%arg0: i32) -> (i32, i32) {
    %c0_i32 = arith.constant 0 : i32
    %c0_i32_0 = arith.constant 0 : i32
    %c0_i32_1 = arith.constant 0 : i32
    return %c0_i32, %c0_i32_0 : i32, i32
  }
  func.func @transform_5(%arg0: i32) -> (i32, i32) {
    %c0_i32 = arith.constant 0 : i32
    %c0_i32_0 = arith.constant 0 : i32
    %c0_i32_1 = arith.constant 0 : i32
    return %c0_i32, %c0_i32_0 : i32, i32
  }
  func.func @transform_6(%arg0: i32) -> (i32, i32) {
    %c0_i32 = arith.constant 0 : i32
    %c0_i32_0 = arith.constant 0 : i32
    return %arg0, %c0_i32 : i32, i32
  }
}

</mosaic_0001>

<bundles_post_ra>
// kernel: tpu_custom_call.1
= control target key start
LH: loop header
LB: loop body
LE: loop exit
PB: predicated region body
PF: predicated region fallthrough
CT: control target
= control target key end

     0   :  { %s3573_s0 = inlined_call_operand.hbm [shape: f32[256,512], index: 0, kind: input, shape index: {}]   ;;  %s3574_s1 = inlined_call_operand.hbm [shape: bf16[512,256], index: 1, kind: input, shape index: {}]   ;;  %s3575_s2 = inlined_call_operand.hbm [shape: f32[1,256], index: 2, kind: input, shape index: {}]   ;;  %s3576_s3 = inlined_call_operand.hbm [shape: f32[256,256], index: 3, kind: input, shape index: {}]   ;;  %s3577_s4 = inlined_call_operand.vmem [shape: f32[1,256], index: 4, kind: input, shape index: {}]   ;;  %s3578_s5 = inlined_call_operand.vmem [shape: f32[1,256], index: 5, kind: input, shape index: {}]   ;;  %s3579_s6 = inlined_call_operand.hbm [shape: f32[256,256], index: 6, kind: output, shape index: {}]  }
   0x1   :  { %3581 = sst [smem:[#allocation17_spill]] %s3573_s0 }
   0x2   :  { %3582 = sst [smem:[#allocation18_spill]] %s3574_s1 }
   0x3   :  { %3583 = sst [smem:[#allocation19_spill]] %s3575_s2 }
   0x4   :  { %11 = vsyncpa [#allocation3], 0 }
   0x5   :  { %13 = vsyncpa [#allocation3 + $0x1], 0 }
   0x6   :  { %14 = vsyncpa [#allocation6], 0 }
   0x7   :  { %15 = vsyncpa [#allocation9], 0 }
   0x8   :  { %17 = vsyncpa [#allocation9 + $0x1], 0 }
   0x9   :  { %18 = vsyncpa [#allocation4], 0 }
   0xa   :  { %20 = vsyncpa [#allocation4 + $0x1], 0  ;;  %s2647_s21 = smov 0   ;;  %s2649_s22 = smov 0  }
   0xb   :  { %s2651_s23 = smov 0   ;;  %s2653_s24 = smov 0  }
   0xc LB: > { %3584 = sst [smem:[#allocation15_spill]] %s2595_s23  ;;  %s2668_s25 = sadd.s32 4294967295, %s2599_s24   ;;  %s2599_s24 = sphi %s2653_s24, %s3599_s24   ;;  %s2595_s23 = sphi %s2651_s23, %s3596_s23   ;;  %s2591_s22 = sphi %s2649_s22, %s3598_s22   ;;  %s2587_s21 = sphi %s2647_s21, %s3597_s21  }
   0xd   : > { %s1939_s26 = sadd.s32 4294967294, %s2599_s24   ;;  %p46_p0 = scmp.ne.s32.totalorder %s2591_s22, %s2587_s21 }
   0xe   : > { %p47_p1 = scmp.eq.s32.totalorder %s2668_s25, 0  ;;  %p180_p2 = scmp.eq.s32.totalorder %s2668_s25, 1 }
   0xf   : > { %p186_p3 = scmp.eq.s32.totalorder %s1939_s26, 1  ;;  %p1940_p5 = scmp.ge.s32.totalorder %s2599_s24, 1 }
  0x10   : > { %p2677_p4 = por %p47_p1, %p46_p0  ;;  %p193_p7 = scmp.lt.s32.totalorder %s2599_s24, 3 }
  0x11   : > { %p2682_p6 = por %p186_p3, %p46_p0  ;;  %s3587_s1 = sld [smem:[#allocation18_spill]] }
  0x12   : > { %p2690_p8 = pnand %p1940_p5, %p193_p7  ;;  %s2601_s9 = smov [#allocation5]  }
  0x13   : > { %s206_s10 = sshll.u32 %s2601_s9, 4  ;;  %s3589_s2 = sld [smem:[#allocation19_spill]]  ;;  %s207_s10 = int_to_ptr.vmem [resolvable:$true] %s206_s10 }
  0x14   : > { %p2304_p9 = pneg %p2690_p8  ;;  %s2602_s14 = smov 128  }
  0x15   : > { %s2603_s15 = smov 8   ;;  %s2604_s16 = smov [#allocation7]  }
  0x16   : > { %p2305_p10 = pnand %p2304_p9, %p47_p1  ;;  %s221_s17 = sshll.u32 %s2604_s16, 4  ;;  %s222_s17 = int_to_ptr.vmem [resolvable:$true] %s221_s17 }
  0x17   : > { %s204_s7 = sshll.u32 %s3587_s1, 4  ;;  %s2703_s18 = sadd.s32 1, %s2599_s24   ;;  %s205_s7 = int_to_ptr.hbm [resolvable:$true] %s204_s7 }
  0x18   : > { %2307 = dma.hbm_to_vmem [thread:$0]  (!%p2305_p10), %s205_s7, 8192, %s207_s10, [#allocation6], %s2602_s14, %s2602_s14, %s2603_s15  }
  0x19   : > { %s219_s13 = sshll.u32 %s3589_s2, 4  ;;  %s33_s19 = sadd.s32 1, %s2595_s23  ;;  %s220_s13 = int_to_ptr.hbm [resolvable:$true] %s219_s13 }
  0x1a   : > { %2310 = dma.hbm_to_vmem [thread:$0]  (!%p2305_p10), %s220_s13, 32, %s222_s17, [#allocation6]  }
  0x1b   : > { %s30_s20 = ssub.s32 %s2599_s24, %s2703_s18  ;;  %p40_p12 = scmp.ne.s32.totalorder %s2595_s23, %s2591_s22 }
  0x1c   : > { %p31_p13 = scmp.eq.s32.totalorder %s30_s20, 0  ;;  %p41_p0 = scmp.eq.s32.totalorder %s2599_s24, 0 }
  0x1d   : > { %p2713_p3 = por %p180_p2, %p40_p12  ;;  %p2324_p5 = scmp.lt.s32.totalorder %s2599_s24, 2 }
  0x1e   : > { %s2719_s29 = scalar_select %p31_p13, %s2595_s23, %s33_s19  }
  0x1f   : > { %p42_p7 = por %p41_p0, %p40_p12  ;;  %s2722_s30 = sand.u32 1, %s2595_s23  }
  0x20   : > { %3591 = sst [smem:[#allocation16_spill]] %s2719_s29  ;;  %s1944_s7 = sshll.u32 %s2722_s30, 9 }
  0x21   : > { %s2221_s9 = sshll.u32 %s2599_s24, 9  ;;  %s3592_s0 = sld [smem:[#allocation17_spill]] }
  0x22   : > { %s242_s13 = scalar_lea.vmem [#allocation2], %s1944_s7  ;;  %p2729_p2 = pnand %p2324_p5, %p42_p7 }
  0x23   : > { %s251_s14 = sshll.u32 %s242_s13, 4  ;;  %s239_s17 = scalar_lea.sflag [#allocation3], %s2722_s30  ;;  %s252_s14 = int_to_ptr.vmem [resolvable:$true] %s251_s14 }
  0x24   : > { %p2469_p10 = pneg %p2729_p2 }
  0x27   : > { %s248_s12 = scalar_lea.hbm %s3592_s0, %s2221_s9  ;;  %s2472_s10 = scalar_lea.hbm %s3592_s0, 1024 }
  0x28   : > { %s249_s15 = sshll.u32 %s248_s12, 4  ;;  %s250_s15 = int_to_ptr.hbm [resolvable:$true] %s249_s15 }
  0x29   : > { %s2465_s19 = sshra.s32 %s250_s15, 4  ;;  %s2466_s19 = int_to_ptr.hbm [resolvable:$true] %s2465_s19 }
  0x2a   : > { %s2467_s20 = scalar_lea.hbm %s2466_s19, 512  ;;  %p2473_p0 = scmp.lt.s32.totalorder %s2466_s19, %s3592_s0 }
  0x2b   : > { %p2468_p9 = scmp.ne.s32.totalorder %s2466_s19, %s2467_s20  ;;  %p2474_p5 = scmp.lt.s32.totalorder %s2472_s10, %s2467_s20 }
  0x2d   : > { %p2470_p12 = pnand %p2469_p10, %p2468_p9  ;;  %p2475_p7 = por %p2474_p5, %p2473_p0 }
  0x2f   : > { %p2471_p13 = pneg %p2470_p12 }
  0x31   : > { %p2476_p11 = pnand %p2475_p7, %p2471_p13 }
  0x33   : > { %2479 = shalt.err (!%p2476_p11)
}
  0x34   : > { %s2605_s13 = smov 512   ;;  %s2606_s1 = smov 32  }
  0x35   : > { %2314 = dma.hbm_to_vmem [thread:$0]  (!%p2729_p2), %s250_s15, 8192, %s252_s14, %s239_s17, %s2605_s13, %s2605_s13, %s2606_s1  }
  0x36   : > { %s1948_s2 = sshll.u32 %s2722_s30, 8  ;;  %s2223_s7 = sshll.u32 %s2599_s24, 8 }
  0x37   : > { %s271_s11 = scalar_lea.hbm %s3576_s3, %s2223_s7  ;;  %s265_s20 = scalar_lea.vmem [#allocation8], %s1948_s2 }
  0x38   : > { %s272_s19 = sshll.u32 %s271_s11, 4  ;;  %s274_s10 = sshll.u32 %s265_s20, 4  ;;  %s273_s19 = int_to_ptr.hbm [resolvable:$true] %s272_s19  ;;  %s275_s10 = int_to_ptr.vmem [resolvable:$true] %s274_s10 }
  0x39   : > { %s262_s12 = scalar_lea.sflag [#allocation9], %s2722_s30  ;;  %s2495_s0 = sshra.s32 %s273_s19, 4  ;;  %s2496_s0 = int_to_ptr.hbm [resolvable:$true] %s2495_s0 }
  0x3a   : > { %s2497_s23 = scalar_lea.hbm %s2496_s0, 256  ;;  %s2502_s15 = scalar_lea.hbm %s3576_s3, 512 }
  0x3b   : > { %p2498_p11 = scmp.ne.s32.totalorder %s2496_s0, %s2497_s23  ;;  %p2503_p13 = scmp.lt.s32.totalorder %s2496_s0, %s3576_s3 }
  0x3c   : > { %p2504_p0 = scmp.lt.s32.totalorder %s2502_s15, %s2497_s23 }
  0x3d   : > { %p2500_p9 = pnand %p2498_p11, %p2469_p10 }
  0x3e   : > { %p2505_p5 = por %p2504_p0, %p2503_p13 }
  0x3f   : > { %p2501_p12 = pneg %p2500_p9 }
  0x41   : > { %p2506_p7 = pnand %p2505_p5, %p2501_p12 }
  0x43   : > { %2509 = shalt.err (!%p2506_p7)
}
  0x44   : > { %s2607_s2 = smov 256   ;;  %s2608_s30 = smov 16  }
  0x45   : > { %2317 = dma.hbm_to_vmem [thread:$0]  (!%p2729_p2), %s273_s19, 4096, %s275_s10, %s262_s12, %s2607_s2, %s2607_s2, %s2608_s30  }
  0x46   : > { %286 = sbr.rel (%p2690_p8) target bundleno = 778 (0x30a), region = 44  ;;  %s2767_s13 = sand.u32 (!%p2690_p8), 1, %s2591_s22  }
  0x47   : > { %s1953_s7 = sshll.u32 (!%p2690_p8), %s2767_s13, 9  ;;  %s289_s0 = scalar_lea.sflag (!%p2690_p8), [#allocation3], %s2767_s13 }
  0x48   : > { %s2771_s23 = scalar_lea.vmem (!%p2690_p8), [#allocation2], %s1953_s7 }
  0x4b   : > { %2570 = dma.done.wait (%p2677_p4), %s289_s0, 8192  }
  0x4c   : > { %2572 = vsyncadd (%p2677_p4), %s289_s0, 4294959104 }
  0x4d   : > { %2574 = dma.done.wait (%p47_p1), [#allocation6], 8224  }
  0x4e   : > { %2576 = vsyncadd (%p47_p1), [#allocation6], 4294959072  ;;  %s1956_s8 = sshll.u32 %s2767_s13, 8  ;;  %s309_s16 = scalar_lea.sflag [#allocation9], %s2767_s13 }
  0x4f   : > { %s2785_s9 = scalar_lea.vmem [#allocation8], %s1956_s8 }
  0x50   : > { %2578 = dma.done.wait (%p2677_p4), %s309_s16, 4096  }
  0x51   : > { %2580 = vsyncadd (%p2677_p4), %s309_s16, 4294963200  ;;  %v2016_v0 = vld [vmem:[#allocation5 + $0x70] sm:$0xf]  ;;  %v2239_v1 = vld [vmem:[#allocation5 + $0x74] sm:$0xf0]  ;;  %s3403_s10 = scalar_lea.vmem [#allocation10], %s1956_s8 }
  0x52   : > { %v2080_v2 = vld [vmem:[#allocation5 + $0xf0] sm:$0xf]  ;;  %v2017_v3 = vor.u32 %v2239_v1, %v2016_v0  ;;  %v2255_v4 = vld [vmem:[#allocation5 + $0xf4] sm:$0xf0]  ;;  %v2008_v11 = vld [vmem:[#allocation5 + $0x60] sm:$0xf] }
  0x53   : > { %v2144_v5 = vld [vmem:[#allocation5 + $0x170] sm:$0xf]  ;;  %v2271_v6 = vld [vmem:[#allocation5 + $0x174] sm:$0xf0]  ;;  %v2081_v7 = vor.u32 %v2255_v4, %v2080_v2  ;;  %v2237_v13 = vld [vmem:[#allocation5 + $0x64] sm:$0xf0] }
  0x54   : > { %v2145_v8 = vor.u32 %v2271_v6, %v2144_v5  ;;  %v2208_v9 = vld [vmem:[#allocation5 + $0x1f0] sm:$0xf]  ;;  %v2287_v10 = vld [vmem:[#allocation5 + $0x1f4] sm:$0xf0]  ;;  %836 = vmatpush.bf16.msra.mxu0 %v2017_v3  ;;  %v2072_v14 = vld [vmem:[#allocation5 + $0xe0] sm:$0xf]  ;;  %v2009_v16 = vor.u32 %v2237_v13, %v2008_v11 }
  0x55   : > { %v2209_v12 = vor.u32 %v2287_v10, %v2208_v9  ;;  %v2253_v15 = vld [vmem:[#allocation5 + $0xe4] sm:$0xf0]  ;;  %885 = vmatpush.bf16.msra.mxu1 %v2081_v7  ;;  %v2136_v18 = vld [vmem:[#allocation5 + $0x160] sm:$0xf]  ;;  %v2000_v23 = vld [vmem:[#allocation5 + $0x50] sm:$0xf] }
  0x56   : > { %934 = vmatpush.bf16.msra.mxu2 %v2145_v8  ;;  %v2073_v17 = vor.u32 %v2253_v15, %v2072_v14  ;;  %v2269_v19 = vld [vmem:[#allocation5 + $0x164] sm:$0xf0]  ;;  %v2200_v20 = vld [vmem:[#allocation5 + $0x1e0] sm:$0xf]  ;;  %v2235_v24 = vld [vmem:[#allocation5 + $0x54] sm:$0xf0] }
  0x57   : > { %983 = vmatpush.bf16.msra.mxu3 %v2209_v12  ;;  %v2137_v21 = vor.u32 %v2269_v19, %v2136_v18  ;;  %v2285_v22 = vld [vmem:[#allocation5 + $0x1e4] sm:$0xf0]  ;;  %v2064_v26 = vld [vmem:[#allocation5 + $0xd0] sm:$0xf]  ;;  %v2251_v27 = vld [vmem:[#allocation5 + $0xd4] sm:$0xf0]  ;;  %v2001_v29 = vor.u32 %v2235_v24, %v2000_v23 }
  0x58   : > { %v2201_v25 = vor.u32 %v2285_v22, %v2200_v20  ;;  %v2128_v28 = vld [vmem:[#allocation5 + $0x150] sm:$0xf]  ;;  %837 = vmatpush.bf16.msra.mxu0 %v2009_v16  ;;  %v2267_v30 = vld [vmem:[#allocation5 + $0x154] sm:$0xf0]  ;;  %v2065_v33 = vor.u32 %v2251_v27, %v2064_v26  ;;  %v1992_v35 = vld [vmem:[#allocation5 + $0x40] sm:$0xf] }
  0x59   : > { %v2192_v31 = vld [vmem:[#allocation5 + $0x1d0] sm:$0xf]  ;;  %v2283_v32 = vld [vmem:[#allocation5 + $0x1d4] sm:$0xf0]  ;;  %886 = vmatpush.bf16.msra.mxu1 %v2073_v17  ;;  %v2129_v34 = vor.u32 %v2267_v30, %v2128_v28  ;;  %v2233_v36 = vld [vmem:[#allocation5 + $0x44] sm:$0xf0] }
  0x5a   : > { %935 = vmatpush.bf16.msra.mxu2 %v2137_v21  ;;  %v2056_v37 = vld [vmem:[#allocation5 + $0xc0] sm:$0xf]  ;;  %v2193_v38 = vor.u32 %v2283_v32, %v2192_v31  ;;  %v2249_v39 = vld [vmem:[#allocation5 + $0xc4] sm:$0xf0]  ;;  %v1993_v44 = vor.u32 %v2233_v36, %v1992_v35  ;;  %v1984_v47 = vld [vmem:[#allocation5 + $0x30] sm:$0xf] }
  0x5b   : > { %984 = vmatpush.bf16.msra.mxu3 %v2201_v25  ;;  %v2120_v40 = vld [vmem:[#allocation5 + $0x140] sm:$0xf]  ;;  %v2265_v41 = vld [vmem:[#allocation5 + $0x144] sm:$0xf0]  ;;  %v2057_v45 = vor.u32 %v2249_v39, %v2056_v37  ;;  %v2231_v48 = vld [vmem:[#allocation5 + $0x34] sm:$0xf0] }
  0x5c   : > { %v2184_v42 = vld [vmem:[#allocation5 + $0x1c0] sm:$0xf]  ;;  %v2281_v43 = vld [vmem:[#allocation5 + $0x1c4] sm:$0xf0]  ;;  %838 = vmatpush.bf16.msra.mxu0 %v2001_v29  ;;  %v2121_v46 = vor.u32 %v2265_v41, %v2120_v40  ;;  %v2048_v49 = vld [vmem:[#allocation5 + $0xb0] sm:$0xf]  ;;  %v1985_v56 = vor.u32 %v2231_v48, %v1984_v47 }
  0x5d   : > { %887 = vmatpush.bf16.msra.mxu1 %v2065_v33  ;;  %v2185_v50 = vor.u32 %v2281_v43, %v2184_v42  ;;  %v2247_v51 = vld [vmem:[#allocation5 + $0xb4] sm:$0xf0]  ;;  %v2112_v52 = vld [vmem:[#allocation5 + $0x130] sm:$0xf]  ;;  %v1976_v59 = vld [vmem:[#allocation5 + $0x20] sm:$0xf] }
  0x5e   : > { %936 = vmatpush.bf16.msra.mxu2 %v2129_v34  ;;  %v2263_v53 = vld [vmem:[#allocation5 + $0x134] sm:$0xf0]  ;;  %v2176_v54 = vld [vmem:[#allocation5 + $0x1b0] sm:$0xf]  ;;  %v2049_v57 = vor.u32 %v2247_v51, %v2048_v49  ;;  %v2229_v60 = vld [vmem:[#allocation5 + $0x24] sm:$0xf0] }
  0x5f   : > { %985 = vmatpush.bf16.msra.mxu3 %v2193_v38  ;;  %v2279_v55 = vld [vmem:[#allocation5 + $0x1b4] sm:$0xf0]  ;;  %v2113_v58 = vor.u32 %v2263_v53, %v2112_v52  ;;  %v2040_v61 = vld [vmem:[#allocation5 + $0xa0] sm:$0xf]  ;;  %v2245_v63 = vld [vmem:[#allocation5 + $0xa4] sm:$0xf0]  ;;  %v1977_v4 = vor.u32 %v2229_v60, %v1976_v59 }
  0x60   : > { %839 = vmatpush.bf16.msra.mxu0 %v1993_v44  ;;  %v2177_v62 = vor.u32 %v2279_v55, %v2176_v54  ;;  %v2104_v0 = vld [vmem:[#allocation5 + $0x120] sm:$0xf]  ;;  %v2261_v1 = vld [vmem:[#allocation5 + $0x124] sm:$0xf0]  ;;  %v2041_v5 = vor.u32 %v2245_v63, %v2040_v61  ;;  %v1968_v7 = vld [vmem:[#allocation5 + $0x10] sm:$0xf] }
  0x61   : > { %888 = vmatpush.bf16.msra.mxu1 %v2057_v45  ;;  %v2168_v2 = vld [vmem:[#allocation5 + $0x1a0] sm:$0xf]  ;;  %v2277_v3 = vld [vmem:[#allocation5 + $0x1a4] sm:$0xf0]  ;;  %v2105_v6 = vor.u32 %v2261_v1, %v2104_v0  ;;  %v2227_v8 = vld [vmem:[#allocation5 + $0x14] sm:$0xf0] }
  0x62   : > { %937 = vmatpush.bf16.msra.mxu2 %v2121_v46  ;;  %v2032_v9 = vld [vmem:[#allocation5 + $0x90] sm:$0xf]  ;;  %v2169_v10 = vor.u32 %v2277_v3, %v2168_v2  ;;  %v2243_v11 = vld [vmem:[#allocation5 + $0x94] sm:$0xf0]  ;;  %v1960_v16 = vld [vmem:[#allocation5] sm:$0xf]  ;;  %v1969_v17 = vor.u32 %v2227_v8, %v1968_v7 }
  0x63   : > { %986 = vmatpush.bf16.msra.mxu3 %v2185_v50  ;;  %v2096_v12 = vld [vmem:[#allocation5 + $0x110] sm:$0xf]  ;;  %v2259_v13 = vld [vmem:[#allocation5 + $0x114] sm:$0xf0]  ;;  %v2225_v18 = vld [vmem:[#allocation5 + $0x4] sm:$0xf0]  ;;  %v2033_v21 = vor.u32 %v2243_v11, %v2032_v9 }
  0x64   : > { %840 = vmatpush.bf16.msra.mxu0 %v1985_v56  ;;  %v2160_v14 = vld [vmem:[#allocation5 + $0x190] sm:$0xf]  ;;  %v2275_v15 = vld [vmem:[#allocation5 + $0x194] sm:$0xf0]  ;;  %v2024_v19 = vld [vmem:[#allocation5 + $0x80] sm:$0xf]  ;;  %v2097_v22 = vor.u32 %v2259_v13, %v2096_v12  ;;  %v1961_v34 = vor.u32 %v2225_v18, %v1960_v16 }
  0x65   : > { %889 = vmatpush.bf16.msra.mxu1 %v2049_v57  ;;  %v2241_v20 = vld [vmem:[#allocation5 + $0x84] sm:$0xf0]  ;;  %v2088_v23 = vld [vmem:[#allocation5 + $0x100] sm:$0xf]  ;;  %v2161_v26 = vor.u32 %v2275_v15, %v2160_v14  ;;  %v2270_v32 = vld [vmem:[#allocation5 + $0x174] sm:$0xf] }
  0x66   : > { %938 = vmatpush.bf16.msra.mxu2 %v2113_v58  ;;  %v2257_v24 = vld [vmem:[#allocation5 + $0x104] sm:$0xf0]  ;;  %v2152_v25 = vld [vmem:[#allocation5 + $0x180] sm:$0xf]  ;;  %v2146_v33 = vld [vmem:[#allocation5 + $0x178] sm:$0xf0]  ;;  %v2025_v38 = vor.u32 %v2241_v20, %v2024_v19 }
  0x67   : > { %987 = vmatpush.bf16.msra.mxu3 %v2177_v62  ;;  %v2273_v27 = vld [vmem:[#allocation5 + $0x184] sm:$0xf0]  ;;  %v350_v28 = vld [vmem:[%s2771_s23] sm:$0xff]  ;;  %v352_v35 = vld [vmem:[%s2771_s23 + $0x10] sm:$0xff]  ;;  %v2089_v39 = vor.u32 %v2257_v24, %v2088_v23  ;;  %v2149_v44 = vor.u32 %v2270_v32, %v2146_v33  ;;  %s2289_s12 = sshll.u32 %s2668_s25, 8  ;;  %s1821_s25 = sshll.u32 %s3403_s10, 4  ;;  %s1822_s25 = int_to_ptr.vmem [resolvable:$true] %s1821_s25 }
  0x68   : > { %841 = vmatpush.bf16.msra.mxu0 %v1977_v4  ;;  %v354_v29 = vld [vmem:[%s2771_s23 + $0x20] sm:$0xff]  ;;  %v351_v30 = vld [vmem:[%s2771_s23 + $0x8] sm:$0xff]  ;;  %v2286_v36 = vld [vmem:[#allocation5 + $0x1f4] sm:$0xf]  ;;  %v2153_v43 = vor.u32 %v2273_v27, %v2152_v25  ;;  %s1820_s15 = scalar_lea.hbm %s3579_s6, %s2289_s12  ;;  %s1808_s17 = scalar_lea.sflag [#allocation4], %s2767_s13 }
  0x69   : > { %890 = vmatpush.bf16.msra.mxu1 %v2041_v5  ;;  %v355_v31 = vld [vmem:[%s2771_s23 + $0x28] sm:$0xff]  ;;  %v2210_v37 = vld [vmem:[#allocation5 + $0x1f8] sm:$0xf0]  ;;  %v356_v40 = vld [vmem:[%s2771_s23 + $0x30] sm:$0xff]  ;;  %v2799_v48 = vpack.c.bf16 %v354_v29, %v350_v28  ;;  %s1823_s29 = sshll.u32 %s1820_s15, 4  ;;  %s1824_s29 = int_to_ptr.hbm [resolvable:$true] %s1823_s29 }
  0x6a   : > { %939 = vmatpush.bf16.msra.mxu2 %v2105_v6  ;;  %v353_v41 = vld [vmem:[%s2771_s23 + $0x18] sm:$0xff]  ;;  %v2238_v45 = vld [vmem:[#allocation5 + $0x74] sm:$0xf]  ;;  %v2213_v49 = vor.u32 %v2286_v36, %v2210_v37  ;;  %v2268_v51 = vld [vmem:[#allocation5 + $0x164] sm:$0xf]  ;;  %v2801_v53 = vpack.c.bf16 %v355_v31, %v351_v30  ;;  %v2803_v54 = vpack.c.bf16 %v356_v40, %v352_v35  ;;  %s2539_s2 = sshra.s32 %s1824_s29, 4  ;;  %s2540_s2 = int_to_ptr.hbm [resolvable:$true] %s2539_s2 }
  0x6b   : > { %988 = vmatpush.bf16.msra.mxu3 %v2169_v10  ;;  %v357_v42 = vld [vmem:[%s2771_s23 + $0x38] sm:$0xff]  ;;  %v2254_v47 = vld [vmem:[#allocation5 + $0xf4] sm:$0xf]  ;;  %v2138_v52 = vld [vmem:[#allocation5 + $0x168] sm:$0xf0]  ;;  %s2541_s30 = scalar_lea.hbm %s2540_s2, 256  ;;  %p2546_p2 = scmp.lt.s32.totalorder %s2540_s2, %s3579_s6 }
  0x6c   : > { %842 = vmatpush.bf16.msra.mxu0 %v1969_v17  ;;  %v2018_v46 = vld [vmem:[#allocation5 + $0x78] sm:$0xf0]  ;;  %v2284_v55 = vld [vmem:[#allocation5 + $0x1e4] sm:$0xf]  ;;  %v2202_v56 = vld [vmem:[#allocation5 + $0x1e8] sm:$0xf0]  ;;  %v2805_v57 = vpack.c.bf16 %v357_v42, %v353_v41  ;;  %v2141_v60 = vor.u32 %v2268_v51, %v2138_v52  ;;  %p2542_p1 = scmp.ne.s32.totalorder %s2540_s2, %s2541_s30 }
  0x6d   : > { %891 = vmatpush.bf16.msra.mxu1 %v2033_v21  ;;  %v2082_v50 = vld [vmem:[#allocation5 + $0xf8] sm:$0xf0]  ;;  %v2021_v58 = vor.u32 %v2238_v45, %v2018_v46  ;;  %v2236_v61 = vld [vmem:[#allocation5 + $0x64] sm:$0xf]  ;;  %v2010_v62 = vld [vmem:[#allocation5 + $0x68] sm:$0xf0]  ;;  %v2205_v63 = vor.u32 %v2284_v55, %v2202_v56 }
  0x6e   : > { %940 = vmatpush.bf16.msra.mxu2 %v2097_v22  ;;  %v2085_v59 = vor.u32 %v2254_v47, %v2082_v50  ;;  %v2252_v0 = vld [vmem:[#allocation5 + $0xe4] sm:$0xf]  ;;  %v2074_v1 = vld [vmem:[#allocation5 + $0xe8] sm:$0xf0]  ;;  %v2013_v2 = vor.u32 %v2236_v61, %v2010_v62  ;;  %v2266_v3 = vld [vmem:[#allocation5 + $0x154] sm:$0xf]  ;;  %p2543_p4 = pnand %p2542_p1, %p2713_p3 }
  0x6f   : > { %989 = vmatpush.bf16.msra.mxu3 %v2161_v26  ;;  %v2130_v4 = vld [vmem:[#allocation5 + $0x158] sm:$0xf0]  ;;  %v2234_v5 = vld [vmem:[#allocation5 + $0x54] sm:$0xf]  ;;  %v2077_v6 = vor.u32 %v2252_v0, %v2074_v1  ;;  %v358_v16 = vld [vmem:[%s2771_s23 + $0x40] sm:$0xff] }
  0x70   : > { %843 = vmatpush.bf16.msra.mxu0 %v1961_v34  ;;  %v2133_v7 = vor.u32 %v2266_v3, %v2130_v4  ;;  %v2002_v8 = vld [vmem:[#allocation5 + $0x58] sm:$0xf0]  ;;  %v2282_v9 = vld [vmem:[#allocation5 + $0x1d4] sm:$0xf]  ;;  %v362_v17 = vld [vmem:[%s2771_s23 + $0x60] sm:$0xff]  ;;  %p2544_p8 = pneg %p2543_p4 }
  0x71   : > { %892 = vmatpush.bf16.msra.mxu1 %v2025_v38  ;;  %v2194_v10 = vld [vmem:[#allocation5 + $0x1d8] sm:$0xf0]  ;;  %v2250_v12 = vld [vmem:[#allocation5 + $0xd4] sm:$0xf]  ;;  %v2005_v14 = vor.u32 %v2234_v5, %v2002_v8  ;;  %v359_v18 = vld [vmem:[%s2771_s23 + $0x48] sm:$0xff]  ;;  %v2819_v24 = vpack.c.bf16 %v362_v17, %v358_v16 }
  0x72   : > { %941 = vmatpush.bf16.msra.mxu2 %v2089_v39  ;;  %v2197_v11 = vor.u32 %v2282_v9, %v2194_v10  ;;  %v2066_v13 = vld [vmem:[#allocation5 + $0xd8] sm:$0xf0]  ;;  %v363_v19 = vld [vmem:[%s2771_s23 + $0x68] sm:$0xff]  ;;  %v360_v20 = vld [vmem:[%s2771_s23 + $0x50] sm:$0xff] }
  0x73   : > { %990 = vmatpush.bf16.msra.mxu3 %v2153_v43  ;;  %844 = vmatmul.bf16.vlgmr.msra.gmra.mxu0 %v2799_v48  ;;  %v2069_v15 = vor.u32 %v2250_v12, %v2066_v13  ;;  %v364_v21 = vld [vmem:[%s2771_s23 + $0x70] sm:$0xff]  ;;  %v361_v22 = vld [vmem:[%s2771_s23 + $0x58] sm:$0xff]  ;;  %v2821_v25 = vpack.c.bf16 %v363_v19, %v359_v18  ;;  %v2264_v28 = vld [vmem:[#allocation5 + $0x144] sm:$0xf] }
  0x74   : > { %893 = vmatmul.bf16.vlgmr.msra.gmra.mxu1 %v2801_v53  ;;  %1032 = vmatpush.bf16.msrb.mxu0 %v2021_v58  ;;  %v365_v23 = vld [vmem:[%s2771_s23 + $0x78] sm:$0xff]  ;;  %v2823_v26 = vpack.c.bf16 %v364_v21, %v360_v20  ;;  %v2122_v29 = vld [vmem:[#allocation5 + $0x148] sm:$0xf0]  ;;  %v2232_v30 = vld [vmem:[#allocation5 + $0x44] sm:$0xf] }
  0x75   : > { %942 = vmatmul.bf16.vlgmr.msra.gmra.mxu2 %v2803_v54  ;;  %1081 = vmatpush.bf16.msrb.mxu1 %v2085_v59  ;;  %v2825_v27 = vpack.c.bf16 %v365_v23, %v361_v22  ;;  %v2125_v31 = vor.u32 %v2264_v28, %v2122_v29  ;;  %v1994_v32 = vld [vmem:[#allocation5 + $0x48] sm:$0xf0]  ;;  %v2280_v33 = vld [vmem:[#allocation5 + $0x1c4] sm:$0xf]  ;;  %v372_v45 = vld [vmem:[%s2771_s23 + $0xb0] sm:$0xff] }
  0x76   : > { %1130 = vmatpush.bf16.msrb.mxu2 %v2149_v44  ;;  %991 = vmatmul.bf16.vlgmr.msra.gmra.mxu3 %v2805_v57  ;;  %v2186_v34 = vld [vmem:[#allocation5 + $0x1c8] sm:$0xf0]  ;;  %v1997_v35 = vor.u32 %v2232_v30, %v1994_v32  ;;  %v2248_v37 = vld [vmem:[#allocation5 + $0xc4] sm:$0xf]  ;;  %v368_v44 = vld [vmem:[%s2771_s23 + $0x90] sm:$0xff] }
  0x77   : > { %1179 = vmatpush.bf16.msrb.mxu3 %v2213_v49  ;;  %v2189_v36 = vor.u32 %v2280_v33, %v2186_v34  ;;  %v2058_v38 = vld [vmem:[#allocation5 + $0xc8] sm:$0xf0]  ;;  %v366_v40 = vld [vmem:[%s2771_s23 + $0x80] sm:$0xff]  ;;  %v369_v46 = vld [vmem:[%s2771_s23 + $0x98] sm:$0xff]  ;;  %v2843_v51 = vpack.c.bf16 %v372_v45, %v368_v44 }
  0x78   : > { %1033 = vmatpush.bf16.msrb.mxu0 %v2013_v2  ;;  %v2061_v39 = vor.u32 %v2248_v37, %v2058_v38  ;;  %v370_v41 = vld [vmem:[%s2771_s23 + $0xa0] sm:$0xff]  ;;  %v367_v42 = vld [vmem:[%s2771_s23 + $0x88] sm:$0xff]  ;;  %v373_v47 = vld [vmem:[%s2771_s23 + $0xb8] sm:$0xff] }
  0x79   : > { %1082 = vmatpush.bf16.msrb.mxu1 %v2077_v6  ;;  %v371_v43 = vld [vmem:[%s2771_s23 + $0xa8] sm:$0xff]  ;;  %v2839_v49 = vpack.c.bf16 %v370_v41, %v366_v40  ;;  %v2845_v52 = vpack.c.bf16 %v373_v47, %v369_v46  ;;  %v2262_v55 = vld [vmem:[#allocation5 + $0x134] sm:$0xf]  ;;  %v2114_v56 = vld [vmem:[#allocation5 + $0x138] sm:$0xf0] }
  0x7a   : > { %1131 = vmatpush.bf16.msrb.mxu2 %v2141_v60  ;;  %v2841_v50 = vpack.c.bf16 %v371_v43, %v367_v42  ;;  %v2230_v58 = vld [vmem:[#allocation5 + $0x34] sm:$0xf]  ;;  %v2117_v59 = vor.u32 %v2262_v55, %v2114_v56  ;;  %v1986_v60 = vld [vmem:[#allocation5 + $0x38] sm:$0xf0]  ;;  %v374_v4 = vld [vmem:[%s2771_s23 + $0xc0] sm:$0xff] }
  0x7b   : > { %1180 = vmatpush.bf16.msrb.mxu3 %v2205_v63  ;;  %v2278_v61 = vld [vmem:[#allocation5 + $0x1b4] sm:$0xf]  ;;  %v2178_v62 = vld [vmem:[#allocation5 + $0x1b8] sm:$0xf0]  ;;  %v1989_v63 = vor.u32 %v2230_v58, %v1986_v60  ;;  %v378_v5 = vld [vmem:[%s2771_s23 + $0xe0] sm:$0xff] }
  0x7c   : > { %1034 = vmatpush.bf16.msrb.mxu0 %v2005_v14  ;;  %v2181_v0 = vor.u32 %v2278_v61, %v2178_v62  ;;  %v2246_v1 = vld [vmem:[#allocation5 + $0xb4] sm:$0xf]  ;;  %v2050_v2 = vld [vmem:[#allocation5 + $0xb8] sm:$0xf0]  ;;  %v375_v6 = vld [vmem:[%s2771_s23 + $0xc8] sm:$0xff]  ;;  %v2859_v12 = vpack.c.bf16 %v378_v5, %v374_v4 }
  0x7d   : > { %1083 = vmatpush.bf16.msrb.mxu1 %v2069_v15  ;;  %v2053_v3 = vor.u32 %v2246_v1, %v2050_v2  ;;  %v376_v8 = vld [vmem:[%s2771_s23 + $0xd0] sm:$0xff]  ;;  %v377_v10 = vld [vmem:[%s2771_s23 + $0xd8] sm:$0xff]  ;;  %v2260_v16 = vld [vmem:[#allocation5 + $0x124] sm:$0xf] }
  0x7e   : > { %1132 = vmatpush.bf16.msrb.mxu2 %v2133_v7  ;;  %v379_v7 = vld [vmem:[%s2771_s23 + $0xe8] sm:$0xff]  ;;  %v380_v9 = vld [vmem:[%s2771_s23 + $0xf0] sm:$0xff]  ;;  %v2228_v18 = vld [vmem:[#allocation5 + $0x24] sm:$0xf] }
  0x7f   : > { %1181 = vmatpush.bf16.msrb.mxu3 %v2197_v11  ;;  %v381_v11 = vld [vmem:[%s2771_s23 + $0xf8] sm:$0xff]  ;;  %v2861_v13 = vpack.c.bf16 %v379_v7, %v375_v6  ;;  %v2863_v14 = vpack.c.bf16 %v380_v9, %v376_v8  ;;  %v2106_v17 = vld [vmem:[#allocation5 + $0x128] sm:$0xf0]  ;;  %v2276_v21 = vld [vmem:[#allocation5 + $0x1a4] sm:$0xf] }
  0x80   : > { %1035 = vmatpush.bf16.msrb.mxu0 %v1997_v35  ;;  %v2865_v15 = vpack.c.bf16 %v381_v11, %v377_v10  ;;  %v2109_v19 = vor.u32 %v2260_v16, %v2106_v17  ;;  %v1978_v20 = vld [vmem:[#allocation5 + $0x28] sm:$0xf0]  ;;  %v2244_v29 = vld [vmem:[#allocation5 + $0xa4] sm:$0xf]  ;;  %v388_v37 = vld [vmem:[%s2771_s23 + $0x130] sm:$0xff] }
  0x81   : > { %1084 = vmatpush.bf16.msrb.mxu1 %v2061_v39  ;;  %v2170_v22 = vld [vmem:[#allocation5 + $0x1a8] sm:$0xf0]  ;;  %v1981_v23 = vor.u32 %v2228_v18, %v1978_v20  ;;  %v382_v32 = vld [vmem:[%s2771_s23 + $0x100] sm:$0xff]  ;;  %v385_v38 = vld [vmem:[%s2771_s23 + $0x118] sm:$0xff] }
  0x82   : > { %1133 = vmatpush.bf16.msrb.mxu2 %v2125_v31  ;;  %v2173_v28 = vor.u32 %v2276_v21, %v2170_v22  ;;  %v2042_v30 = vld [vmem:[#allocation5 + $0xa8] sm:$0xf0]  ;;  %v386_v33 = vld [vmem:[%s2771_s23 + $0x120] sm:$0xff]  ;;  %v389_v39 = vld [vmem:[%s2771_s23 + $0x138] sm:$0xff] }
  0x83   : > { %849 = vmatmul.bf16.gmra.mxu0 %v2819_v24  ;;  %1182 = vmatpush.bf16.msrb.mxu3 %v2189_v36  ;;  %v2045_v31 = vor.u32 %v2244_v29, %v2042_v30  ;;  %v383_v34 = vld [vmem:[%s2771_s23 + $0x108] sm:$0xff]  ;;  %v384_v36 = vld [vmem:[%s2771_s23 + $0x110] sm:$0xff]  ;;  %v2879_v40 = vpack.c.bf16 %v386_v33, %v382_v32  ;;  %v2885_v43 = vpack.c.bf16 %v389_v39, %v385_v38  ;;  %v2098_v45 = vld [vmem:[#allocation5 + $0x118] sm:$0xf0] }
  0x84   : > { %898 = vmatmul.bf16.gmra.mxu1 %v2821_v25  ;;  %1036 = vmatpush.bf16.msrb.mxu0 %v1989_v63  ;;  %v387_v35 = vld [vmem:[%s2771_s23 + $0x128] sm:$0xff]  ;;  %v2883_v42 = vpack.c.bf16 %v388_v37, %v384_v36  ;;  %v2258_v44 = vld [vmem:[#allocation5 + $0x114] sm:$0xf]  ;;  %v1970_v55 = vld [vmem:[#allocation5 + $0x18] sm:$0xf0] }
  0x85   : > { %947 = vmatmul.bf16.gmra.mxu2 %v2823_v26  ;;  %1085 = vmatpush.bf16.msrb.mxu1 %v2053_v3  ;;  %v2881_v41 = vpack.c.bf16 %v387_v35, %v383_v34  ;;  %v2226_v46 = vld [vmem:[#allocation5 + $0x14] sm:$0xf]  ;;  %v2101_v47 = vor.u32 %v2258_v44, %v2098_v45  ;;  %v2162_v58 = vld [vmem:[#allocation5 + $0x198] sm:$0xf0]  ;;  %v394_v1 = vld [vmem:[%s2771_s23 + $0x160] sm:$0xff] }
  0x86   : > { %996 = vmatmul.bf16.gmra.mxu3 %v2825_v27  ;;  %1134 = vmatpush.bf16.msrb.mxu2 %v2117_v59  ;;  %v2274_v56 = vld [vmem:[#allocation5 + $0x194] sm:$0xf]  ;;  %v1973_v59 = vor.u32 %v2226_v46, %v1970_v55  ;;  %v2034_v62 = vld [vmem:[#allocation5 + $0x98] sm:$0xf0]  ;;  %v391_v2 = vld [vmem:[%s2771_s23 + $0x148] sm:$0xff] }
  0x87   : > { %1183 = vmatpush.bf16.msrb.mxu3 %v2181_v0  ;;  %v2165_v60 = vor.u32 %v2274_v56, %v2162_v58  ;;  %v2242_v61 = vld [vmem:[#allocation5 + $0x94] sm:$0xf]  ;;  %v390_v0 = vld [vmem:[%s2771_s23 + $0x140] sm:$0xff]  ;;  %v395_v3 = vld [vmem:[%s2771_s23 + $0x168] sm:$0xff] }
  0x88   : > { %1037 = vmatpush.bf16.msrb.mxu0 %v1981_v23  ;;  %v2037_v63 = vor.u32 %v2242_v61, %v2034_v62  ;;  %v392_v4 = vld [vmem:[%s2771_s23 + $0x150] sm:$0xff]  ;;  %v393_v6 = vld [vmem:[%s2771_s23 + $0x158] sm:$0xff]  ;;  %v2899_v8 = vpack.c.bf16 %v394_v1, %v390_v0  ;;  %v2901_v9 = vpack.c.bf16 %v395_v3, %v391_v2  ;;  %v2256_v16 = vld [vmem:[#allocation5 + $0x104] sm:$0xf] }
  0x89   : > { %1086 = vmatpush.bf16.msrb.mxu1 %v2045_v31  ;;  %v396_v5 = vld [vmem:[%s2771_s23 + $0x170] sm:$0xff]  ;;  %v397_v7 = vld [vmem:[%s2771_s23 + $0x178] sm:$0xff]  ;;  %v2090_v17 = vld [vmem:[#allocation5 + $0x108] sm:$0xf0] }
  0x8a   : > { %1135 = vmatpush.bf16.msrb.mxu2 %v2109_v19  ;;  %v2903_v10 = vpack.c.bf16 %v396_v5, %v392_v4  ;;  %v2905_v11 = vpack.c.bf16 %v397_v7, %v393_v6  ;;  %v2224_v18 = vld [vmem:[#allocation5 + $0x4] sm:$0xf]  ;;  %v2093_v19 = vor.u32 %v2256_v16, %v2090_v17  ;;  %v1962_v20 = vld [vmem:[#allocation5 + $0x8] sm:$0xf0]  ;;  %v400_v36 = vld [vmem:[%s2771_s23 + $0x190] sm:$0xff] }
  0x8b   : > { %1184 = vmatpush.bf16.msrb.mxu3 %v2173_v28  ;;  %v2272_v21 = vld [vmem:[#allocation5 + $0x184] sm:$0xf]  ;;  %v2154_v22 = vld [vmem:[#allocation5 + $0x188] sm:$0xf0]  ;;  %v1965_v23 = vor.u32 %v2224_v18, %v1962_v20  ;;  %v404_v37 = vld [vmem:[%s2771_s23 + $0x1b0] sm:$0xff] }
  0x8c   : > { %1038 = vmatpush.bf16.msrb.mxu0 %v1973_v59  ;;  %v2157_v28 = vor.u32 %v2272_v21, %v2154_v22  ;;  %v2240_v29 = vld [vmem:[#allocation5 + $0x84] sm:$0xf]  ;;  %v2026_v30 = vld [vmem:[#allocation5 + $0x88] sm:$0xf0]  ;;  %v401_v38 = vld [vmem:[%s2771_s23 + $0x198] sm:$0xff]  ;;  %v2923_v46 = vpack.c.bf16 %v404_v37, %v400_v36 }
  0x8d   : > { %1087 = vmatpush.bf16.msrb.mxu1 %v2037_v63  ;;  %v2029_v31 = vor.u32 %v2240_v29, %v2026_v30  ;;  %v398_v32 = vld [vmem:[%s2771_s23 + $0x180] sm:$0xff]  ;;  %v399_v34 = vld [vmem:[%s2771_s23 + $0x188] sm:$0xff]  ;;  %v405_v39 = vld [vmem:[%s2771_s23 + $0x1b8] sm:$0xff] }
  0x8e   : > { %1136 = vmatpush.bf16.msrb.mxu2 %v2101_v47  ;;  %v402_v33 = vld [vmem:[%s2771_s23 + $0x1a0] sm:$0xff]  ;;  %v403_v35 = vld [vmem:[%s2771_s23 + $0x1a8] sm:$0xff]  ;;  %v2925_v47 = vpack.c.bf16 %v405_v39, %v401_v38  ;;  %v412_v61 = vld [vmem:[%s2771_s23 + $0x1f0] sm:$0xff] }
  0x8f   : > { %1185 = vmatpush.bf16.msrb.mxu3 %v2165_v60  ;;  %v2919_v44 = vpack.c.bf16 %v402_v33, %v398_v32  ;;  %v2921_v45 = vpack.c.bf16 %v403_v35, %v399_v34  ;;  %v406_v55 = vld [vmem:[%s2771_s23 + $0x1c0] sm:$0xff]  ;;  %v407_v58 = vld [vmem:[%s2771_s23 + $0x1c8] sm:$0xff]  ;;  %v408_v60 = vld [vmem:[%s2771_s23 + $0x1d0] sm:$0xff] }
  0x90   : > { %1039 = vmatpush.bf16.msrb.mxu0 %v1965_v23  ;;  %v410_v56 = vld [vmem:[%s2771_s23 + $0x1e0] sm:$0xff]  ;;  %v411_v59 = vld [vmem:[%s2771_s23 + $0x1e8] sm:$0xff]  ;;  %v409_v62 = vld [vmem:[%s2771_s23 + $0x1d8] sm:$0xff]  ;;  %v2943_v2 = vpack.c.bf16 %v412_v61, %v408_v60 }
  0x91   : > { %1088 = vmatpush.bf16.msrb.mxu1 %v2029_v31  ;;  %v413_v63 = vld [vmem:[%s2771_s23 + $0x1f8] sm:$0xff]  ;;  %v2939_v0 = vpack.c.bf16 %v410_v56, %v406_v55  ;;  %v2941_v1 = vpack.c.bf16 %v411_v59, %v407_v58  ;;  %v2951_v4 = vld [vmem:[#allocation7] sm:$0x3]  ;;  %s2545_s23 = scalar_lea.hbm %s3579_s6, 512 }
  0x92   : > { %1137 = vmatpush.bf16.msrb.mxu2 %v2093_v19  ;;  %v2945_v3 = vpack.c.bf16 %v413_v63, %v409_v62  ;;  %v2954_v5 = vperm.slane %v2951_v4, 0  ;;  %p2547_p10 = scmp.lt.s32.totalorder %s2545_s23, %s2541_s30 }
  0x93   : > { %854 = vmatmul.bf16.gmra.mxu0 %v2839_v49  ;;  %1186 = vmatpush.bf16.msrb.mxu3 %v2157_v28 }
  0x94   : > { %903 = vmatmul.bf16.gmra.mxu1 %v2841_v50  ;;  %p2548_p11 = por %p2547_p10, %p2546_p2 }
  0x95   : > { %952 = vmatmul.bf16.gmra.mxu2 %v2843_v51 }
  0x96   : > { %1001 = vmatmul.bf16.gmra.mxu3 %v2845_v52  ;;  %p2549_p9 = pnand %p2548_p11, %p2544_p8 }
  0xa3   : > { %859 = vmatmul.bf16.gmra.mxu0 %v2859_v12 }
  0xa4   : > { %908 = vmatmul.bf16.gmra.mxu1 %v2861_v13 }
  0xa5   : > { %957 = vmatmul.bf16.gmra.mxu2 %v2863_v14 }
  0xa6   : > { %1006 = vmatmul.bf16.gmra.mxu3 %v2865_v15 }
  0xb3   : > { %864 = vmatmul.bf16.gmra.mxu0 %v2879_v40 }
  0xb4   : > { %913 = vmatmul.bf16.gmra.mxu1 %v2881_v41 }
  0xb5   : > { %962 = vmatmul.bf16.gmra.mxu2 %v2883_v42 }
  0xb6   : > { %1011 = vmatmul.bf16.gmra.mxu3 %v2885_v43 }
  0xc3   : > { %869 = vmatmul.bf16.gmra.mxu0 %v2899_v8 }
  0xc4   : > { %918 = vmatmul.bf16.gmra.mxu1 %v2901_v9 }
  0xc5   : > { %967 = vmatmul.bf16.gmra.mxu2 %v2903_v10 }
  0xc6   : > { %1016 = vmatmul.bf16.gmra.mxu3 %v2905_v11 }
  0xd3   : > { %874 = vmatmul.bf16.gmra.mxu0 %v2919_v44 }
  0xd4   : > { %923 = vmatmul.bf16.gmra.mxu1 %v2921_v45 }
  0xd5   : > { %972 = vmatmul.bf16.gmra.mxu2 %v2923_v46 }
  0xd6   : > { %1021 = vmatmul.bf16.gmra.mxu3 %v2925_v47 }
  0xe3   : > { %879 = vmatmul.bf16.gmra.mxu0 %v2939_v0 }
  0xe4   : > { %928 = vmatmul.bf16.gmra.mxu1 %v2941_v1 }
  0xe5   : > { %977 = vmatmul.bf16.gmra.mxu2 %v2943_v2 }
  0xe6   : > { %1026 = vmatmul.bf16.gmra.mxu3 %v2945_v3 }
  0xf0   : > { %v845_v6 = vpop.f32.mrf.mxu0 }
  0xf1   : > { %v846_v7 = vadd.f32 %v845_v6, %v2954_v5  ;;  %v894_v16 = vpop.f32.mrf.mxu1 }
  0xf3   : > { %v895_v17 = vadd.f32 %v894_v16, %v846_v7  ;;  %1040 = vmatmul.bf16.vlgmr.msrb.gmra.mxu0 %v2799_v48 }
  0xf4   : > { %1089 = vmatmul.bf16.vlgmr.msrb.gmra.mxu1 %v2801_v53 }
  0xf5   : > { %1138 = vmatmul.bf16.vlgmr.msrb.gmra.mxu2 %v2803_v54 }
  0xf6   : > { %1187 = vmatmul.bf16.vlgmr.msrb.gmra.mxu3 %v2805_v57 }
  0xf8   : > { %v943_v18 = vpop.f32.mrf.mxu2  ;;  %v847_v21 = vpop.f32.mrf.mxu0 }
  0xf9   : > { %v944_v19 = vadd.f32 %v943_v18, %v895_v17  ;;  %v992_v20 = vpop.f32.mrf.mxu3  ;;  %v848_v22 = vadd.f32 %v847_v21, %v2954_v5  ;;  %v896_v23 = vpop.f32.mrf.mxu1 }
  0xfb   : > { %v2962_v28 = vadd.f32 %v992_v20, %v944_v19  ;;  %v897_v29 = vadd.f32 %v896_v23, %v848_v22 }
 0x100   : > { %v945_v30 = vpop.f32.mrf.mxu2  ;;  %v850_v48 = vpop.f32.mrf.mxu0 }
 0x101   : > { %v946_v31 = vadd.f32 %v945_v30, %v897_v29  ;;  %v994_v32 = vpop.f32.mrf.mxu3  ;;  %v851_v53 = vadd.f32 %v850_v48, %v2954_v5  ;;  %v899_v33 = vpop.f32.mrf.mxu1 }
 0x103   : > { %v2965_v54 = vadd.f32 %v994_v32, %v946_v31  ;;  %v900_v57 = vadd.f32 %v899_v33, %v851_v53  ;;  %1045 = vmatmul.bf16.gmra.mxu0 %v2819_v24 }
 0x104   : > { %1094 = vmatmul.bf16.gmra.mxu1 %v2821_v25 }
 0x105   : > { %1143 = vmatmul.bf16.gmra.mxu2 %v2823_v26 }
 0x106   : > { %1192 = vmatmul.bf16.gmra.mxu3 %v2825_v27 }
 0x108   : > { %v948_v34 = vpop.f32.mrf.mxu2  ;;  %v852_v37 = vpop.f32.mrf.mxu0 }
 0x109   : > { %v949_v35 = vadd.f32 %v948_v34, %v900_v57  ;;  %v997_v36 = vpop.f32.mrf.mxu3  ;;  %v853_v38 = vadd.f32 %v852_v37, %v2954_v5  ;;  %v901_v39 = vpop.f32.mrf.mxu1 }
 0x10b   : > { %v2972_v55 = vadd.f32 %v997_v36, %v949_v35  ;;  %v902_v56 = vadd.f32 %v901_v39, %v853_v38 }
 0x110   : > { %v950_v58 = vpop.f32.mrf.mxu2  ;;  %v855_v24 = vpop.f32.mrf.mxu0 }
 0x111   : > { %v951_v59 = vadd.f32 %v950_v58, %v902_v56  ;;  %v999_v60 = vpop.f32.mrf.mxu3  ;;  %v856_v25 = vadd.f32 %v855_v24, %v2954_v5  ;;  %v904_v61 = vpop.f32.mrf.mxu1 }
 0x113   : > { %v2975_v26 = vadd.f32 %v999_v60, %v951_v59  ;;  %v905_v27 = vadd.f32 %v904_v61, %v856_v25  ;;  %1050 = vmatmul.bf16.gmra.mxu0 %v2839_v49 }
 0x114   : > { %1099 = vmatmul.bf16.gmra.mxu1 %v2841_v50 }
 0x115   : > { %1148 = vmatmul.bf16.gmra.mxu2 %v2843_v51 }
 0x116   : > { %1197 = vmatmul.bf16.gmra.mxu3 %v2845_v52 }
 0x118   : > { %v953_v62 = vpop.f32.mrf.mxu2  ;;  %v857_v7 = vpop.f32.mrf.mxu0 }
 0x119   : > { %v954_v63 = vadd.f32 %v953_v62, %v905_v27  ;;  %v1002_v6 = vpop.f32.mrf.mxu3  ;;  %v858_v16 = vadd.f32 %v857_v7, %v2954_v5  ;;  %v906_v17 = vpop.f32.mrf.mxu1 }
 0x11b   : > { %v2982_v18 = vadd.f32 %v1002_v6, %v954_v63  ;;  %v907_v19 = vadd.f32 %v906_v17, %v858_v16 }
 0x120   : > { %v955_v20 = vpop.f32.mrf.mxu2  ;;  %v860_v49 = vpop.f32.mrf.mxu0 }
 0x121   : > { %v956_v21 = vadd.f32 %v955_v20, %v907_v19  ;;  %v1004_v22 = vpop.f32.mrf.mxu3  ;;  %v861_v50 = vadd.f32 %v860_v49, %v2954_v5  ;;  %v909_v23 = vpop.f32.mrf.mxu1 }
 0x123   : > { %v2985_v51 = vadd.f32 %v1004_v22, %v956_v21  ;;  %v910_v52 = vadd.f32 %v909_v23, %v861_v50  ;;  %1055 = vmatmul.bf16.gmra.mxu0 %v2859_v12 }
 0x124   : > { %1104 = vmatmul.bf16.gmra.mxu1 %v2861_v13 }
 0x125   : > { %1153 = vmatmul.bf16.gmra.mxu2 %v2863_v14 }
 0x126   : > { %1202 = vmatmul.bf16.gmra.mxu3 %v2865_v15 }
 0x128   : > { %v958_v29 = vpop.f32.mrf.mxu2  ;;  %v862_v32 = vpop.f32.mrf.mxu0 }
 0x129   : > { %v959_v30 = vadd.f32 %v958_v29, %v910_v52  ;;  %v1007_v31 = vpop.f32.mrf.mxu3  ;;  %v863_v48 = vadd.f32 %v862_v32, %v2954_v5  ;;  %v911_v53 = vpop.f32.mrf.mxu1 }
 0x12b   : > { %v2992_v33 = vadd.f32 %v1007_v31, %v959_v30  ;;  %v912_v57 = vadd.f32 %v911_v53, %v863_v48 }
 0x130   : > { %v960_v34 = vpop.f32.mrf.mxu2  ;;  %v865_v12 = vpop.f32.mrf.mxu0 }
 0x131   : > { %v961_v35 = vadd.f32 %v960_v34, %v912_v57  ;;  %v1009_v36 = vpop.f32.mrf.mxu3  ;;  %v866_v13 = vadd.f32 %v865_v12, %v2954_v5  ;;  %v914_v37 = vpop.f32.mrf.mxu1 }
 0x133   : > { %v2995_v14 = vadd.f32 %v1009_v36, %v961_v35  ;;  %v915_v15 = vadd.f32 %v914_v37, %v866_v13  ;;  %1060 = vmatmul.bf16.gmra.mxu0 %v2879_v40 }
 0x134   : > { %1109 = vmatmul.bf16.gmra.mxu1 %v2881_v41 }
 0x135   : > { %1158 = vmatmul.bf16.gmra.mxu2 %v2883_v42 }
 0x136   : > { %1207 = vmatmul.bf16.gmra.mxu3 %v2885_v43 }
 0x138   : > { %v963_v38 = vpop.f32.mrf.mxu2  ;;  %v867_v58 = vpop.f32.mrf.mxu0 }
 0x139   : > { %v964_v39 = vadd.f32 %v963_v38, %v915_v15  ;;  %v1012_v56 = vpop.f32.mrf.mxu3  ;;  %v868_v59 = vadd.f32 %v867_v58, %v2954_v5  ;;  %v916_v60 = vpop.f32.mrf.mxu1 }
 0x13b   : > { %v3002_v24 = vadd.f32 %v1012_v56, %v964_v39  ;;  %v917_v25 = vadd.f32 %v916_v60, %v868_v59 }
 0x140   : > { %v965_v61 = vpop.f32.mrf.mxu2  ;;  %v870_v40 = vpop.f32.mrf.mxu0 }
 0x141   : > { %v966_v27 = vadd.f32 %v965_v61, %v917_v25  ;;  %v1014_v62 = vpop.f32.mrf.mxu3  ;;  %v871_v41 = vadd.f32 %v870_v40, %v2954_v5  ;;  %v919_v63 = vpop.f32.mrf.mxu1 }
 0x143   : > { %v3005_v42 = vadd.f32 %v1014_v62, %v966_v27  ;;  %v920_v43 = vadd.f32 %v919_v63, %v871_v41  ;;  %1065 = vmatmul.bf16.gmra.mxu0 %v2899_v8 }
 0x144   : > { %1114 = vmatmul.bf16.gmra.mxu1 %v2901_v9 }
 0x145   : > { %1163 = vmatmul.bf16.gmra.mxu2 %v2903_v10 }
 0x146   : > { %1212 = vmatmul.bf16.gmra.mxu3 %v2905_v11 }
 0x148   : > { %v968_v6 = vpop.f32.mrf.mxu2  ;;  %v872_v17 = vpop.f32.mrf.mxu0 }
 0x149   : > { %v969_v7 = vadd.f32 %v968_v6, %v920_v43  ;;  %v1017_v16 = vpop.f32.mrf.mxu3  ;;  %v873_v19 = vadd.f32 %v872_v17, %v2954_v5  ;;  %v921_v20 = vpop.f32.mrf.mxu1 }
 0x14b   : > { %v3012_v21 = vadd.f32 %v1017_v16, %v969_v7  ;;  %v922_v22 = vadd.f32 %v921_v20, %v873_v19  ;;  %v1228_v7 = vld [vmem:[%s2785_s9] sm:$0xff] }
 0x14c   : > { %v3044_v19 = vadd.f32 %v1228_v7, %v2962_v28 }
 0x150   : > { %v970_v49 = vpop.f32.mrf.mxu2  ;;  %v875_v8 = vpop.f32.mrf.mxu0 }
 0x151   : > { %v971_v50 = vadd.f32 %v970_v49, %v922_v22  ;;  %v1019_v23 = vpop.f32.mrf.mxu3  ;;  %v876_v9 = vadd.f32 %v875_v8, %v2954_v5  ;;  %v924_v52 = vpop.f32.mrf.mxu1 }
 0x153   : > { %v3015_v10 = vadd.f32 %v1019_v23, %v971_v50  ;;  %v925_v11 = vadd.f32 %v924_v52, %v876_v9  ;;  %1070 = vmatmul.bf16.gmra.mxu0 %v2919_v44  ;;  %v1231_v52 = vld [vmem:[%s2785_s9 + $0x18] sm:$0xff] }
 0x154   : > { %1119 = vmatmul.bf16.gmra.mxu1 %v2921_v45 }
 0x155   : > { %1168 = vmatmul.bf16.gmra.mxu2 %v2923_v46 }
 0x156   : > { %1217 = vmatmul.bf16.gmra.mxu3 %v2925_v47 }
 0x158   : > { %v973_v29 = vpop.f32.mrf.mxu2  ;;  %v877_v32 = vpop.f32.mrf.mxu0 }
 0x159   : > { %v974_v30 = vadd.f32 %v973_v29, %v925_v11  ;;  %v1022_v31 = vpop.f32.mrf.mxu3  ;;  %v878_v48 = vadd.f32 %v877_v32, %v2954_v5  ;;  %v926_v53 = vpop.f32.mrf.mxu1 }
 0x15b   : > { %v3022_v57 = vadd.f32 %v1022_v31, %v974_v30  ;;  %v927_v34 = vadd.f32 %v926_v53, %v878_v48  ;;  %v1230_v30 = vld [vmem:[%s2785_s9 + $0x10] sm:$0xff] }
 0x15c   : > { %v3056_v48 = vadd.f32 %v1230_v30, %v2965_v54  ;;  %v1239_v30 = vld [vmem:[%s2785_s9 + $0x58] sm:$0xff] }
 0x160   : > { %v975_v35 = vpop.f32.mrf.mxu2  ;;  %v880_v44 = vpop.f32.mrf.mxu0 }
 0x161   : > { %v976_v36 = vadd.f32 %v975_v35, %v927_v34  ;;  %v1024_v12 = vpop.f32.mrf.mxu3  ;;  %v881_v45 = vadd.f32 %v880_v44, %v2954_v5  ;;  %v929_v13 = vpop.f32.mrf.mxu1 }
 0x163   : > { %v3025_v46 = vadd.f32 %v1024_v12, %v976_v36  ;;  %v930_v47 = vadd.f32 %v929_v13, %v881_v45  ;;  %1075 = vmatmul.bf16.gmra.mxu0 %v2939_v0  ;;  %v3035_v0 = vperm.slane %v2951_v4, 1  ;;  %v1229_v4 = vld [vmem:[%s2785_s9 + $0x8] sm:$0xff]  ;;  %v1232_v45 = vld [vmem:[%s2785_s9 + $0x20] sm:$0xff] }
 0x164   : > { %1124 = vmatmul.bf16.gmra.mxu1 %v2941_v1  ;;  %v1233_v13 = vld [vmem:[%s2785_s9 + $0x28] sm:$0xff] }
 0x165   : > { %1173 = vmatmul.bf16.gmra.mxu2 %v2943_v2 }
 0x166   : > { %1222 = vmatmul.bf16.gmra.mxu3 %v2945_v3 }
 0x168   : > { %v978_v37 = vpop.f32.mrf.mxu2  ;;  %v882_v39 = vpop.f32.mrf.mxu0 }
 0x169   : > { %v979_v15 = vadd.f32 %v978_v37, %v930_v47  ;;  %v1027_v38 = vpop.f32.mrf.mxu3  ;;  %v883_v56 = vadd.f32 %v882_v39, %v2954_v5  ;;  %v931_v58 = vpop.f32.mrf.mxu1 }
 0x16b   : > { %v3032_v59 = vadd.f32 %v1027_v38, %v979_v15  ;;  %v932_v60 = vadd.f32 %v931_v58, %v883_v56  ;;  %v3064_v15 = vadd.f32 %v1232_v45, %v2972_v55 }
 0x170   : > { %v980_v1 = vpop.f32.mrf.mxu2  ;;  %v1041_v61 = vpop.f32.mrf.mxu0 }
 0x171   : > { %v981_v25 = vadd.f32 %v980_v1, %v932_v60  ;;  %v1029_v2 = vpop.f32.mrf.mxu3  ;;  %v1042_v3 = vadd.f32 %v1041_v61, %v3035_v0  ;;  %v1090_v27 = vpop.f32.mrf.mxu1 }
 0x173   : > { %v3038_v62 = vadd.f32 %v1029_v2, %v981_v25  ;;  %v1091_v40 = vadd.f32 %v1090_v27, %v1042_v3  ;;  %v1235_v25 = vld [vmem:[%s2785_s9 + $0x38] sm:$0xff]  ;;  %v1234_v3 = vld [vmem:[%s2785_s9 + $0x30] sm:$0xff] }
 0x178   : > { %v1139_v5 = vpop.f32.mrf.mxu2  ;;  %v1043_v43 = vpop.f32.mrf.mxu0 }
 0x179   : > { %v1140_v41 = vadd.f32 %v1139_v5, %v1091_v40  ;;  %v1188_v63 = vpop.f32.mrf.mxu3  ;;  %v1092_v6 = vpop.f32.mrf.mxu1  ;;  %v1044_v17 = vadd.f32 %v1043_v43, %v3035_v0  ;;  %v3076_v5 = vadd.f32 %v1234_v3, %v2975_v26 }
 0x17b   : > { %v1189_v16 = vadd.f32 %v1188_v63, %v1140_v41  ;;  %v1093_v22 = vadd.f32 %v1092_v6, %v1044_v17  ;;  %v1237_v17 = vld [vmem:[%s2785_s9 + $0x48] sm:$0xff] }
 0x17d   : > { %v3046_v20 = vadd.f32 %v1229_v4, %v1189_v16  ;;  %v1236_v16 = vld [vmem:[%s2785_s9 + $0x40] sm:$0xff] }
 0x17f   : > { %v1292_v49 = vadd.f32 %v3046_v20, %v3044_v19 }
 0x180   : > { %v1141_v50 = vpop.f32.mrf.mxu2  ;;  %v1046_v9 = vpop.f32.mrf.mxu0 }
 0x181   : > { %v1142_v23 = vadd.f32 %v1141_v50, %v1093_v22  ;;  %v1190_v8 = vpop.f32.mrf.mxu3  ;;  %1293 = vadd.xlane.f32.xlu0 %v1292_v49  ;;  %v1047_v11 = vadd.f32 %v1046_v9, %v3035_v0  ;;  %v1095_v29 = vpop.f32.mrf.mxu1  ;;  %v3084_v50 = vadd.f32 %v1236_v16, %v2982_v18 }
 0x183   : > { %v1191_v28 = vadd.f32 %v1190_v8, %v1142_v23  ;;  %v1096_v32 = vadd.f32 %v1095_v29, %v1047_v11 }
 0x185   : > { %v3053_v31 = vadd.f32 %v1231_v52, %v1191_v28 }
 0x187   : > { %v1295_v53 = vadd.f32 %v3053_v31, %v3056_v48 }
 0x188   : > { %v1144_v34 = vpop.f32.mrf.mxu2  ;;  %v1048_v12 = vpop.f32.mrf.mxu0 }
 0x189   : > { %v1145_v35 = vadd.f32 %v1144_v34, %v1096_v32  ;;  %v1193_v36 = vpop.f32.mrf.mxu3  ;;  %1296 = vadd.xlane.f32.xlu0 %v1295_v53  ;;  %v1097_v44 = vpop.f32.mrf.mxu1  ;;  %v1049_v37 = vadd.f32 %v1048_v12, %v3035_v0  ;;  %v1238_v53 = vld [vmem:[%s2785_s9 + $0x50] sm:$0xff] }
 0x18b   : > { %v1194_v47 = vadd.f32 %v1193_v36, %v1145_v35  ;;  %v1098_v38 = vadd.f32 %v1097_v44, %v1049_v37  ;;  %v3096_v36 = vadd.f32 %v1238_v53, %v2985_v51  ;;  %v1240_v37 = vld [vmem:[%s2785_s9 + $0x60] sm:$0xff] }
 0x18d   : > { %v3066_v54 = vadd.f32 %v1233_v13, %v1194_v47 }
 0x18f   : > { %v1298_v39 = vadd.f32 %v3066_v54, %v3064_v15 }
 0x190   : > { %v1146_v56 = vpop.f32.mrf.mxu2  ;;  %v1051_v1 = vpop.f32.mrf.mxu0 }
 0x191   : > { %v1147_v58 = vadd.f32 %v1146_v56, %v1098_v38  ;;  %v1195_v60 = vpop.f32.mrf.mxu3  ;;  %1299 = vadd.xlane.f32.xlu1 %v1298_v39  ;;  %v1052_v2 = vadd.f32 %v1051_v1, %v3035_v0  ;;  %v1100_v61 = vpop.f32.mrf.mxu1  ;;  %v1241_v38 = vld [vmem:[%s2785_s9 + $0x68] sm:$0xff] }
 0x193   : > { %v1196_v55 = vadd.f32 %v1195_v60, %v1147_v58  ;;  %v1101_v40 = vadd.f32 %v1100_v61, %v1052_v2  ;;  %v3104_v60 = vadd.f32 %v1240_v37, %v2992_v33 }
 0x195   : > { %v3073_v27 = vadd.f32 %v1235_v25, %v1196_v55 }
 0x197   : > { %v1301_v41 = vadd.f32 %v3073_v27, %v3076_v5 }
 0x198   : > { %v1149_v63 = vpop.f32.mrf.mxu2  ;;  %v1053_v7 = vpop.f32.mrf.mxu0 }
 0x199   : > { %v1150_v43 = vadd.f32 %v1149_v63, %v1101_v40  ;;  %v1198_v6 = vpop.f32.mrf.mxu3  ;;  %1302 = vadd.xlane.f32.xlu1 %v1301_v41  ;;  %v1102_v4 = vpop.f32.mrf.mxu1  ;;  %v1054_v49 = vadd.f32 %v1053_v7, %v3035_v0  ;;  %v1243_v40 = vld [vmem:[%s2785_s9 + $0x78] sm:$0xff] }
 0x19b   : > { %v1199_v22 = vadd.f32 %v1198_v6, %v1150_v43  ;;  %v1103_v23 = vadd.f32 %v1102_v4, %v1054_v49  ;;  %v1242_v43 = vld [vmem:[%s2785_s9 + $0x70] sm:$0xff] }
 0x19c   : > { %v3116_v4 = vadd.f32 %v1242_v43, %v2995_v14 }
 0x19d   : > { %v3086_v26 = vadd.f32 %v1237_v17, %v1199_v22 }
 0x19f   : > { %v1304_v8 = vadd.f32 %v3086_v26, %v3084_v50 }
 0x1a0   : > { %v1151_v9 = vpop.f32.mrf.mxu2  ;;  %v1056_v29 = vpop.f32.mrf.mxu0 }
 0x1a1   : > { %v1152_v52 = vadd.f32 %v1151_v9, %v1103_v23  ;;  %v1200_v11 = vpop.f32.mrf.mxu3  ;;  %1305 = vadd.xlane.f32.xlu2 %v1304_v8  ;;  %v1057_v28 = vadd.f32 %v1056_v29, %v3035_v0  ;;  %v1105_v32 = vpop.f32.mrf.mxu1  ;;  %v1244_v8 = vld [vmem:[%s2785_s9 + $0x80] sm:$0xff]  ;;  %v1245_v9 = vld [vmem:[%s2785_s9 + $0x88] sm:$0xff] }
 0x1a3   : > { %v1201_v18 = vadd.f32 %v1200_v11, %v1152_v52  ;;  %v1106_v35 = vadd.f32 %v1105_v32, %v1057_v28 }
 0x1a5   : > { %v3093_v34 = vadd.f32 %v1239_v30, %v1201_v18  ;;  %v3124_v30 = vadd.f32 %v1244_v8, %v3002_v24 }
 0x1a7   : > { %v1307_v12 = vadd.f32 %v3093_v34, %v3096_v36 }
 0x1a8   : > { %v1154_v44 = vpop.f32.mrf.mxu2  ;;  %v1058_v47 = vpop.f32.mrf.mxu0 }
 0x1a9   : > { %v1155_v45 = vadd.f32 %v1154_v44, %v1106_v35  ;;  %v1203_v13 = vpop.f32.mrf.mxu3  ;;  %1308 = vadd.xlane.f32.xlu2 %v1307_v12  ;;  %v1107_v39 = vpop.f32.mrf.mxu1  ;;  %v1059_v58 = vadd.f32 %v1058_v47, %v3035_v0  ;;  %v1246_v44 = vld [vmem:[%s2785_s9 + $0x90] sm:$0xff] }
 0x1aa   : > { %v3134_v37 = vadd.f32 %v1246_v44, %v3005_v42  ;;  %v1252_v44 = vld [vmem:[%s2785_s9 + $0xc0] sm:$0xff] }
 0x1ab   : > { %v1204_v56 = vadd.f32 %v1203_v13, %v1155_v45  ;;  %v1108_v1 = vadd.f32 %v1107_v39, %v1059_v58  ;;  %v1247_v45 = vld [vmem:[%s2785_s9 + $0x98] sm:$0xff] }
 0x1ad   : > { %v3106_v51 = vadd.f32 %v1241_v38, %v1204_v56 }
 0x1af   : > { %v1310_v25 = vadd.f32 %v3106_v51, %v3104_v60 }
 0x1b0   : > { %v1156_v2 = vpop.f32.mrf.mxu2  ;;  %v1061_v55 = vpop.f32.mrf.mxu0 }
 0x1b1   : > { %v1157_v61 = vadd.f32 %v1156_v2, %v1108_v1  ;;  %v1205_v3 = vpop.f32.mrf.mxu3  ;;  %1311 = vadd.xlane.f32.xlu0 %v1310_v25  ;;  %v1062_v41 = vadd.f32 %v1061_v55, %v3035_v0  ;;  %v1110_v63 = vpop.f32.mrf.mxu1 }
 0x1b3   : > { %v1206_v33 = vadd.f32 %v1205_v3, %v1157_v61  ;;  %v1111_v7 = vadd.f32 %v1110_v63, %v1062_v41  ;;  %v1248_v61 = vld [vmem:[%s2785_s9 + $0xa0] sm:$0xff]  ;;  %v1249_v3 = vld [vmem:[%s2785_s9 + $0xa8] sm:$0xff] }
 0x1b4   : > { %v3144_v41 = vadd.f32 %v1248_v61, %v3012_v21 }
 0x1b5   : > { %v3113_v6 = vadd.f32 %v1243_v40, %v1206_v33 }
 0x1b7   : > { %v1313_v16 = vadd.f32 %v3113_v6, %v3116_v4 }
 0x1b8   : > { %v1159_v17 = vpop.f32.mrf.mxu2  ;;  %v1063_v23 = vpop.f32.mrf.mxu0 }
 0x1b9   : > { %v1160_v22 = vadd.f32 %v1159_v17, %v1111_v7  ;;  %v1208_v49 = vpop.f32.mrf.mxu3  ;;  %1314 = vadd.xlane.f32.xlu1 %v1313_v16  ;;  %v1112_v52 = vpop.f32.mrf.mxu1  ;;  %v1064_v29 = vadd.f32 %v1063_v23, %v3035_v0  ;;  %v1251_v23 = vld [vmem:[%s2785_s9 + $0xb8] sm:$0xff] }
 0x1bb   : > { %v1209_v11 = vadd.f32 %v1208_v49, %v1160_v22  ;;  %v1113_v28 = vadd.f32 %v1112_v52, %v1064_v29  ;;  %v1250_v49 = vld [vmem:[%s2785_s9 + $0xb0] sm:$0xff] }
 0x1bc   : > { %v3154_v52 = vadd.f32 %v1250_v49, %v3015_v10 }
 0x1bd   : > { %v3126_v14 = vadd.f32 %v1245_v9, %v1209_v11 }
 0x1bf   : > { %v1316_v32 = vadd.f32 %v3126_v14, %v3124_v30 }
 0x1c0   : > { %v1161_v53 = vpop.f32.mrf.mxu2  ;;  %v1066_v12 = vpop.f32.mrf.mxu0 }
 0x1c1   : > { %v1162_v18 = vadd.f32 %v1161_v53, %v1113_v28  ;;  %v1210_v35 = vpop.f32.mrf.mxu3  ;;  %1317 = vadd.xlane.f32.xlu2 %v1316_v32  ;;  %v1067_v13 = vadd.f32 %v1066_v12, %v3035_v0  ;;  %v1115_v47 = vpop.f32.mrf.mxu1  ;;  %v2609_v12 = vmov 256.0  }
 0x1c2   : > { %2371 = vrcp.f32 %v2609_v12 }
 0x1c3   : > { %v1211_v24 = vadd.f32 %v1210_v35, %v1162_v18  ;;  %v1116_v39 = vadd.f32 %v1115_v47, %v1067_v13 }
 0x1c5   : > { %v3136_v38 = vadd.f32 %v1247_v45, %v1211_v24  ;;  %v1253_v45 = vld [vmem:[%s2785_s9 + $0xc8] sm:$0xff]  ;;  %v3164_v24 = vadd.f32 %v1252_v44, %v3022_v57 }
 0x1c7   : > { %v1319_v56 = vadd.f32 %v3136_v38, %v3134_v37 }
 0x1c8   : > { %v1164_v58 = vpop.f32.mrf.mxu2  ;;  %v1068_v2 = vpop.f32.mrf.mxu0 }
 0x1c9   : > { %v1165_v1 = vadd.f32 %v1164_v58, %v1116_v39  ;;  %v1213_v25 = vpop.f32.mrf.mxu3  ;;  %1320 = vadd.xlane.f32.xlu0 %v1319_v56  ;;  %v1117_v55 = vpop.f32.mrf.mxu1  ;;  %v1069_v42 = vadd.f32 %v1068_v2, %v3035_v0 }
 0x1ca   : > { %v2372_v56 = vpop.eup %2371 }
 0x1cb   : > { %v1214_v40 = vadd.f32 %v1213_v25, %v1165_v1  ;;  %v1118_v43 = vadd.f32 %v1117_v55, %v1069_v42  ;;  %v1254_v55 = vld [vmem:[%s2785_s9 + $0xd0] sm:$0xff]  ;;  %v1341_v57 = vmul.f32 256.0, %v2372_v56  ;;  %vm1345_vm0 = vweird.f32 %v2372_v56 }
 0x1cd   : > { %v3146_v63 = vadd.f32 %v1249_v3, %v1214_v40  ;;  %v1255_v40 = vld [vmem:[%s2785_s9 + $0xd8] sm:$0xff] }
 0x1cf   : > { %v1322_v33 = vadd.f32 %v3146_v63, %v3144_v41 }
 0x1d0   : > { %v1166_v7 = vpop.f32.mrf.mxu2  ;;  %v1071_v22 = vpop.f32.mrf.mxu0 }
 0x1d1   : > { %v1167_v16 = vadd.f32 %v1166_v7, %v1118_v43  ;;  %v1215_v17 = vpop.f32.mrf.mxu3  ;;  %1323 = vadd.xlane.f32.xlu1 %v1322_v33  ;;  %v1072_v8 = vadd.f32 %v1071_v22, %v3035_v0  ;;  %v1120_v9 = vpop.f32.mrf.mxu1  ;;  %v3174_v7 = vadd.f32 %v1254_v55, %v3025_v46  ;;  %v1342_v22 = vsub.f32 1.0, %v1341_v57 }
 0x1d3   : > { %v1216_v21 = vadd.f32 %v1215_v17, %v1167_v16  ;;  %v1121_v29 = vadd.f32 %v1120_v9, %v1072_v8 }
 0x1d5   : > { %v3156_v11 = vadd.f32 %v1251_v23, %v1216_v21 }
 0x1d7   : > { %v1325_v28 = vadd.f32 %v3156_v11, %v3154_v52 }
 0x1d8   : > { %v1169_v32 = vpop.f32.mrf.mxu2  ;;  %v1073_v35 = vpop.f32.mrf.mxu0 }
 0x1d9   : > { %v1170_v53 = vadd.f32 %v1169_v32, %v1121_v29  ;;  %v1218_v18 = vpop.f32.mrf.mxu3  ;;  %1326 = vadd.xlane.f32.xlu2 %v1325_v28  ;;  %v1122_v13 = vpop.f32.mrf.mxu1  ;;  %v1074_v47 = vadd.f32 %v1073_v35, %v3035_v0  ;;  %v1256_v29 = vld [vmem:[%s2785_s9 + $0xe0] sm:$0xff]  ;;  %v1257_v28 = vld [vmem:[%s2785_s9 + $0xe8] sm:$0xff]  ;;  %v1343_v32 = vmul.f32 %v2372_v56, %v1342_v22 }
 0x1db   : > { %v1219_v10 = vadd.f32 %v1218_v18, %v1170_v53  ;;  %v1123_v58 = vadd.f32 %v1122_v13, %v1074_v47  ;;  %v3184_v18 = vadd.f32 %v1256_v29, %v3032_v59  ;;  %v1344_v44 = vadd.f32 %v2372_v56, %v1343_v32 }
 0x1dd   : > { %v3166_v39 = vadd.f32 %v1253_v45, %v1219_v10 }
 0x1df   : > { %v1328_v1 = vadd.f32 %v3166_v39, %v3164_v24 }
 0x1e0   : > { %v1171_v25 = vpop.f32.mrf.mxu2  ;;  %v1076_v3 = vpop.f32.mrf.mxu0 }
 0x1e1   : > { %v1172_v2 = vadd.f32 %v1171_v25, %v1123_v58  ;;  %v1220_v61 = vpop.f32.mrf.mxu3  ;;  %1329 = vadd.xlane.f32.xlu0 %v1328_v1  ;;  %v1077_v42 = vadd.f32 %v1076_v3, %v3035_v0  ;;  %v1125_v33 = vpop.f32.mrf.mxu1  ;;  %v1258_v58 = vld [vmem:[%s2785_s9 + $0xf0] sm:$0xff]  ;;  %v1259_v25 = vld [vmem:[%s2785_s9 + $0xf8] sm:$0xff] }
 0x1e3   : > { %v1221_v43 = vadd.f32 %v1220_v61, %v1172_v2  ;;  %v1126_v17 = vadd.f32 %v1125_v33, %v1077_v42  ;;  %v3192_v2 = vsel %vm1345_vm0, %v2372_v56, %v1344_v44  ;;  %v3195_v61 = vadd.f32 %v1258_v58, %v3038_v62 }
 0x1e5   : > { %v3176_v16 = vadd.f32 %v1255_v40, %v1221_v43 }
 0x1e7   : > { %v1331_v49 = vadd.f32 %v3176_v16, %v3174_v7 }
 0x1e8   : > { %v1174_v23 = vpop.f32.mrf.mxu2  ;;  %v1078_v21 = vpop.f32.mrf.mxu0 }
 0x1e9   : > { %v1175_v8 = vadd.f32 %v1174_v23, %v1126_v17  ;;  %v1223_v9 = vpop.f32.mrf.mxu3  ;;  %1332 = vadd.xlane.f32.xlu1 %v1331_v49  ;;  %v1079_v46 = vadd.f32 %v1078_v21, %v3035_v0  ;;  %v1127_v12 = vpop.f32.mrf.mxu1 }
 0x1eb   : > { %v1224_v53 = vadd.f32 %v1223_v9, %v1175_v8  ;;  %v1128_v45 = vadd.f32 %v1127_v12, %v1079_v46 }
 0x1ed   : > { %v3186_v35 = vadd.f32 %v1257_v28, %v1224_v53 }
 0x1ef   : > { %v1334_v13 = vadd.f32 %v3186_v35, %v3184_v18 }
 0x1f0   : > { %v1176_v10 = vpop.f32.mrf.mxu2 }
 0x1f1   : > { %v1177_v47 = vadd.f32 %v1176_v10, %v1128_v45  ;;  %1335 = vadd.xlane.f32.xlu2 %v1334_v13  ;;  %v1225_v1 = vpop.f32.mrf.mxu3 }
 0x1f3   : > { %v1226_v0 = vadd.f32 %v1225_v1, %v1177_v47 }
 0x1f4   : > { %v1294_v59 = vpop.xlane.xlu0 %1293 }
 0x1f5   : > { %v3197_v3 = vadd.f32 %v1259_v25, %v1226_v0  ;;  %v1347_v55 = vmul.f32 %v3192_v2, %v1294_v59 }
 0x1f7   : > { %v3201_v40 = vsub.f32 %v3044_v19, %v1347_v55  ;;  %v3204_v42 = vsub.f32 %v3046_v20, %v1347_v55  ;;  %v1337_v57 = vadd.f32 %v3197_v3, %v3195_v61 }
 0x1f9   : > { %1338 = vadd.xlane.f32.xlu0 %v1337_v57  ;;  %v1395_v56 = vmul.f32 %v3201_v40, %v3201_v40  ;;  %v1396_v62 = vmul.f32 %v3204_v42, %v3204_v42 }
 0x1fb   : > { %v1427_v43 = vadd.f32 %v1396_v62, %v1395_v56 }
 0x1fc   : > { %v1297_v33 = vpop.xlane.xlu0 %1296 }
 0x1fd   : > { %v1348_v17 = vmul.f32 %v3192_v2, %v1297_v33  ;;  %1428 = vadd.xlane.f32.xlu1 %v1427_v43 }
 0x1ff   : > { %v3214_v19 = vsub.f32 %v3056_v48, %v1348_v17  ;;  %v3217_v20 = vsub.f32 %v3053_v31, %v1348_v17 }
 0x201   : > { %v1397_v22 = vmul.f32 %v3214_v19, %v3214_v19  ;;  %v1398_v49 = vmul.f32 %v3217_v20, %v3217_v20 }
 0x203   : > { %v1430_v23 = vadd.f32 %v1398_v49, %v1397_v22 }
 0x204   : > { %v1300_v8 = vpop.xlane.xlu1 %1299 }
 0x205   : > { %v1349_v9 = vmul.f32 %v3192_v2, %v1300_v8  ;;  %1431 = vadd.xlane.f32.xlu2 %v1430_v23 }
 0x207   : > { %v3225_v21 = vsub.f32 %v3064_v15, %v1349_v9  ;;  %v3228_v48 = vsub.f32 %v3066_v54, %v1349_v9 }
 0x209   : > { %v1399_v31 = vmul.f32 %v3225_v21, %v3225_v21  ;;  %v1400_v29 = vmul.f32 %v3228_v48, %v3228_v48 }
 0x20b   : > { %v1433_v28 = vadd.f32 %v1400_v29, %v1399_v31 }
 0x20c   : > { %v1303_v32 = vpop.xlane.xlu1 %1302 }
 0x20d   : > { %v1350_v53 = vmul.f32 %v3192_v2, %v1303_v32  ;;  %1434 = vadd.xlane.f32.xlu0 %v1433_v28 }
 0x20f   : > { %v3236_v46 = vsub.f32 %v3076_v5, %v1350_v53  ;;  %v3239_v15 = vsub.f32 %v3073_v27, %v1350_v53 }
 0x211   : > { %v1401_v54 = vmul.f32 %v3236_v46, %v3236_v46  ;;  %v1402_v12 = vmul.f32 %v3239_v15, %v3239_v15 }
 0x213   : > { %v1436_v44 = vadd.f32 %v1402_v12, %v1401_v54 }
 0x214   : > { %v1306_v45 = vpop.xlane.xlu2 %1305 }
 0x215   : > { %v1351_v13 = vmul.f32 %v3192_v2, %v1306_v45  ;;  %1437 = vadd.xlane.f32.xlu1 %v1436_v44 }
 0x217   : > { %v3247_v10 = vsub.f32 %v3084_v50, %v1351_v13  ;;  %v3250_v5 = vsub.f32 %v3086_v26, %v1351_v13 }
 0x219   : > { %v1403_v27 = vmul.f32 %v3247_v10, %v3247_v10  ;;  %v1404_v47 = vmul.f32 %v3250_v5, %v3250_v5 }
 0x21b   : > { %v1439_v58 = vadd.f32 %v1404_v47, %v1403_v27 }
 0x21c   : > { %v1309_v1 = vpop.xlane.xlu2 %1308 }
 0x21d   : > { %v1352_v25 = vmul.f32 %v3192_v2, %v1309_v1  ;;  %1440 = vadd.xlane.f32.xlu2 %v1439_v58 }
 0x21f   : > { %v3258_v0 = vsub.f32 %v3096_v36, %v1352_v25  ;;  %v3261_v50 = vsub.f32 %v3093_v34, %v1352_v25 }
 0x221   : > { %v1405_v26 = vmul.f32 %v3258_v0, %v3258_v0  ;;  %v1406_v59 = vmul.f32 %v3261_v50, %v3261_v50 }
 0x223   : > { %v1442_v55 = vadd.f32 %v1406_v59, %v1405_v26 }
 0x224   : > { %v1312_v57 = vpop.xlane.xlu0 %1311 }
 0x225   : > { %v1353_v56 = vmul.f32 %v3192_v2, %v1312_v57  ;;  %1443 = vadd.xlane.f32.xlu0 %v1442_v55 }
 0x227   : > { %v3269_v62 = vsub.f32 %v3104_v60, %v1353_v56  ;;  %v3272_v36 = vsub.f32 %v3106_v51, %v1353_v56 }
 0x229   : > { %v1407_v34 = vmul.f32 %v3269_v62, %v3269_v62  ;;  %v1408_v43 = vmul.f32 %v3272_v36, %v3272_v36 }
 0x22b   : > { %v1445_v33 = vadd.f32 %v1408_v43, %v1407_v34 }
 0x22c   : > { %v1315_v17 = vpop.xlane.xlu1 %1314 }
 0x22d   : > { %v1354_v22 = vmul.f32 %v3192_v2, %v1315_v17  ;;  %1446 = vadd.xlane.f32.xlu1 %v1445_v33 }
 0x22f   : > { %v3280_v49 = vsub.f32 %v3116_v4, %v1354_v22  ;;  %v3283_v60 = vsub.f32 %v3113_v6, %v1354_v22 }
 0x231   : > { %v1409_v51 = vmul.f32 %v3280_v49, %v3280_v49  ;;  %v1410_v23 = vmul.f32 %v3283_v60, %v3283_v60 }
 0x233   : > { %v1448_v8 = vadd.f32 %v1410_v23, %v1409_v51 }
 0x234   : > { %v1318_v9 = vpop.xlane.xlu2 %1317 }
 0x235   : > { %v1355_v31 = vmul.f32 %v3192_v2, %v1318_v9  ;;  %1449 = vadd.xlane.f32.xlu2 %v1448_v8 }
 0x237   : > { %v3291_v29 = vsub.f32 %v3124_v30, %v1355_v31  ;;  %v3294_v4 = vsub.f32 %v3126_v14, %v1355_v31 }
 0x239   : > { %v1411_v6 = vmul.f32 %v3291_v29, %v3291_v29  ;;  %v1412_v28 = vmul.f32 %v3294_v4, %v3294_v4 }
 0x23b   : > { %v1451_v32 = vadd.f32 %v1412_v28, %v1411_v6 }
 0x23c   : > { %v1321_v53 = vpop.xlane.xlu0 %1320 }
 0x23d   : > { %v1356_v54 = vmul.f32 %v3192_v2, %v1321_v53  ;;  %1452 = vadd.xlane.f32.xlu0 %v1451_v32 }
 0x23f   : > { %v3302_v12 = vsub.f32 %v3134_v37, %v1356_v54  ;;  %v3305_v30 = vsub.f32 %v3136_v38, %v1356_v54 }
 0x241   : > { %v1413_v14 = vmul.f32 %v3302_v12, %v3302_v12  ;;  %v1414_v44 = vmul.f32 %v3305_v30, %v3305_v30 }
 0x243   : > { %v1454_v45 = vadd.f32 %v1414_v44, %v1413_v14 }
 0x244   : > { %v1324_v13 = vpop.xlane.xlu1 %1323 }
 0x245   : > { %v1357_v27 = vmul.f32 %v3192_v2, %v1324_v13  ;;  %1455 = vadd.xlane.f32.xlu1 %v1454_v45 }
 0x247   : > { %v3313_v47 = vsub.f32 %v3144_v41, %v1357_v27  ;;  %v3316_v37 = vsub.f32 %v3146_v63, %v1357_v27 }
 0x249   : > { %v1415_v38 = vmul.f32 %v3313_v47, %v3313_v47  ;;  %v1416_v58 = vmul.f32 %v3316_v37, %v3316_v37 }
 0x24b   : > { %v1457_v1 = vadd.f32 %v1416_v58, %v1415_v38 }
 0x24c   : > { %v1327_v25 = vpop.xlane.xlu2 %1326 }
 0x24d   : > { %v1358_v26 = vmul.f32 %v3192_v2, %v1327_v25  ;;  %1458 = vadd.xlane.f32.xlu2 %v1457_v1 }
 0x24f   : > { %v3324_v59 = vsub.f32 %v3154_v52, %v1358_v26  ;;  %v3327_v41 = vsub.f32 %v3156_v11, %v1358_v26 }
 0x251   : > { %v1417_v63 = vmul.f32 %v3324_v59, %v3324_v59  ;;  %v1418_v55 = vmul.f32 %v3327_v41, %v3327_v41 }
 0x253   : > { %v1460_v57 = vadd.f32 %v1418_v55, %v1417_v63 }
 0x254   : > { %v1330_v56 = vpop.xlane.xlu0 %1329 }
 0x255   : > { %v1359_v34 = vmul.f32 %v3192_v2, %v1330_v56  ;;  %1461 = vadd.xlane.f32.xlu0 %v1460_v57 }
 0x257   : > { %v3335_v43 = vsub.f32 %v3164_v24, %v1359_v34  ;;  %v3338_v52 = vsub.f32 %v3166_v39, %v1359_v34  ;;  %v1699_v34 = vld [vmem:[%s3577_s4] sm:$0x3] }
 0x259   : > { %v1419_v11 = vmul.f32 %v3335_v43, %v3335_v43  ;;  %v1420_v33 = vmul.f32 %v3338_v52, %v3338_v52 }
 0x25b   : > { %v1463_v17 = vadd.f32 %v1420_v33, %v1419_v11 }
 0x25c   : > { %v1333_v22 = vpop.xlane.xlu1 %1332 }
 0x25d   : > { %v1360_v51 = vmul.f32 %v3192_v2, %v1333_v22  ;;  %1464 = vadd.xlane.f32.xlu1 %v1463_v17  ;;  %v1737_v22 = vld [vmem:[%s3578_s5] sm:$0x3] }
 0x25f   : > { %v3346_v23 = vsub.f32 %v3174_v7, %v1360_v51  ;;  %v3349_v24 = vsub.f32 %v3176_v16, %v1360_v51 }
 0x261   : > { %v1421_v39 = vmul.f32 %v3346_v23, %v3346_v23  ;;  %v1422_v8 = vmul.f32 %v3349_v24, %v3349_v24 }
 0x263   : > { %v1466_v9 = vadd.f32 %v1422_v8, %v1421_v39  ;;  %v3386_v8 = vperm.slane %v1699_v34, 0 }
 0x264   : > { %v1336_v31 = vpop.xlane.xlu2 %1335 }
 0x265   : > { %v1361_v6 = vmul.f32 %v3192_v2, %v1336_v31  ;;  %1467 = vadd.xlane.f32.xlu2 %v1466_v9  ;;  %v3388_v9 = vperm.slane %v1699_v34, 1 }
 0x267   : > { %v3357_v28 = vsub.f32 %v3184_v18, %v1361_v6  ;;  %v3360_v7 = vsub.f32 %v3186_v35, %v1361_v6 }
 0x269   : > { %v1423_v16 = vmul.f32 %v3357_v28, %v3357_v28  ;;  %v1424_v32 = vmul.f32 %v3360_v7, %v3360_v7 }
 0x26b   : > { %v1469_v53 = vadd.f32 %v1424_v32, %v1423_v16  ;;  %v3390_v16 = vperm.slane %v1737_v22, 0  ;;  %v3392_v32 = vperm.slane %v1737_v22, 1 }
 0x26c   : > { %v1339_v54 = vpop.xlane.xlu0 %1338 }
 0x26d   : > { %v1362_v14 = vmul.f32 %v3192_v2, %v1339_v54  ;;  %1470 = vadd.xlane.f32.xlu0 %v1469_v53 }
 0x26f   : > { %v3368_v44 = vsub.f32 %v3195_v61, %v1362_v14  ;;  %v3371_v18 = vsub.f32 %v3197_v3, %v1362_v14 }
 0x270   : > { %v1429_v45 = vpop.xlane.xlu1 %1428 }
 0x271   : > { %v1475_v35 = vmul.f32 %v1429_v45, %v3192_v2  ;;  %v1425_v13 = vmul.f32 %v3368_v44, %v3368_v44  ;;  %v1426_v27 = vmul.f32 %v3371_v18, %v3371_v18 }
 0x273   : > { %v1491_v38 = vadd.f32 1e-05, %v1475_v35  ;;  %v1472_v58 = vadd.f32 %v1426_v27, %v1425_v13 }
 0x275   : > { %2373 = vrsqrt.f32 %v1491_v38  ;;  %1473 = vadd.xlane.f32.xlu1 %v1472_v58  ;;  %vm1513_vm2 = vweird.f32 %v1491_v38 }
 0x278   : > { %v1432_v1 = vpop.xlane.xlu2 %1431 }
 0x279   : > { %v1476_v61 = vmul.f32 %v1432_v1, %v3192_v2 }
 0x27b   : > { %v2374_v25 = vpop.eup %2373  ;;  %v1492_v26 = vadd.f32 1e-05, %v1476_v61 }
 0x27c   : > { %v1508_v3 = vmul.f32 %v2374_v25, %v1491_v38  ;;  %vm1514_vm1 = vweird.f32 %v2374_v25 }
 0x27d   : > { %2375 = vrsqrt.f32 %v1492_v26  ;;  %vm1515_vm3 = vmor %vm1513_vm2, %vm1514_vm1  ;;  %vm1523_vm5 = vweird.f32 %v1492_v26 }
 0x27e   : > { %v1509_v63 = vmul.f32 %v2374_v25, %v1508_v3 }
 0x280   : > { %v1510_v55 = vmul.f32 0.5, %v1509_v63  ;;  %v1435_v57 = vpop.xlane.xlu0 %1434 }
 0x281   : > { %v1477_v56 = vmul.f32 %v1435_v57, %v3192_v2 }
 0x282   : > { %v1511_v11 = vsub.f32 1.5, %v1510_v55 }
 0x283   : > { %v2376_v33 = vpop.eup %2375  ;;  %v1493_v17 = vadd.f32 1e-05, %v1477_v56 }
 0x284   : > { %v1512_v51 = vmul.f32 %v2374_v25, %v1511_v11  ;;  %v1518_v39 = vmul.f32 %v2376_v33, %v1492_v26  ;;  %vm1524_vm4 = vweird.f32 %v2376_v33 }
 0x285   : > { %2377 = vrsqrt.f32 %v1493_v17  ;;  %vm1525_vm6 = vmor %vm1523_vm5, %vm1524_vm4  ;;  %vm1533_vm8 = vweird.f32 %v1493_v17 }
 0x286   : > { %v1516_v31 = vsel %vm1515_vm3, %v2374_v25, %v1512_v51  ;;  %v1519_v6 = vmul.f32 %v2376_v33, %v1518_v39 }
 0x287   : > { %v1667_v53 = vmul.f32 %v1516_v31, %v3201_v40  ;;  %v1668_v54 = vmul.f32 %v1516_v31, %v3204_v42 }
 0x288   : > { %v1520_v14 = vmul.f32 0.5, %v1519_v6  ;;  %v1438_v45 = vpop.xlane.xlu1 %1437 }
 0x289   : > { %v1705_v35 = vmul.f32 %v3386_v8, %v1667_v53  ;;  %v1706_v13 = vmul.f32 %v3388_v9, %v1668_v54  ;;  %v1478_v27 = vmul.f32 %v1438_v45, %v3192_v2 }
 0x28a   : > { %v1521_v38 = vsub.f32 1.5, %v1520_v14 }
 0x28b   : > { %v2378_v58 = vpop.eup %2377  ;;  %v1743_v1 = vadd.f32 %v3390_v16, %v1705_v35  ;;  %v1744_v61 = vadd.f32 %v3392_v32, %v1706_v13  ;;  %v1494_v25 = vadd.f32 1e-05, %v1478_v27 }
 0x28c   : > { %v1522_v40 = vmul.f32 %v2376_v33, %v1521_v38  ;;  %v1528_v3 = vmul.f32 %v2378_v58, %v1493_v17  ;;  %vm1534_vm7 = vweird.f32 %v2378_v58 }
 0x28d   : > { %1775 = vst [vmem:[%s3403_s10] sm:$0xff] %v1743_v1  ;;  %2379 = vrsqrt.f32 %v1494_v25  ;;  %vm1535_vm9 = vmor %vm1533_vm8, %vm1534_vm7  ;;  %vm1543_vm11 = vweird.f32 %v1494_v25 }
 0x28e   : > { %1776 = vst [vmem:[%s3403_s10 + $0x8] sm:$0xff] %v1744_v61  ;;  %v1526_v42 = vsel %vm1525_vm6, %v2376_v33, %v1522_v40  ;;  %v1529_v63 = vmul.f32 %v2378_v58, %v1528_v3 }
 0x28f   : > { %v1669_v55 = vmul.f32 %v1526_v42, %v3214_v19  ;;  %v1670_v57 = vmul.f32 %v1526_v42, %v3217_v20 }
 0x290   : > { %v1530_v56 = vmul.f32 0.5, %v1529_v63  ;;  %v1441_v34 = vpop.xlane.xlu2 %1440 }
 0x291   : > { %v1707_v26 = vmul.f32 %v3386_v8, %v1669_v55  ;;  %v1708_v11 = vmul.f32 %v3388_v9, %v1670_v57  ;;  %v1479_v22 = vmul.f32 %v1441_v34, %v3192_v2 }
 0x292   : > { %v1531_v51 = vsub.f32 1.5, %v1530_v56 }
 0x293   : > { %v2380_v39 = vpop.eup %2379  ;;  %v1745_v33 = vadd.f32 %v3390_v16, %v1707_v26  ;;  %v1746_v31 = vadd.f32 %v3392_v32, %v1708_v11  ;;  %v1495_v19 = vadd.f32 1e-05, %v1479_v22 }
 0x294   : > { %v1532_v6 = vmul.f32 %v2378_v58, %v1531_v51  ;;  %v1538_v20 = vmul.f32 %v2380_v39, %v1494_v25  ;;  %vm1544_vm10 = vweird.f32 %v2380_v39 }
 0x295   : > { %1777 = vst [vmem:[%s3403_s10 + $0x10] sm:$0xff] %v1745_v33  ;;  %2381 = vrsqrt.f32 %v1495_v19  ;;  %vm1545_vm12 = vmor %vm1543_vm11, %vm1544_vm10  ;;  %vm1553_vm14 = vweird.f32 %v1495_v19 }
 0x296   : > { %1778 = vst [vmem:[%s3403_s10 + $0x18] sm:$0xff] %v1746_v31  ;;  %v1536_v53 = vsel %vm1535_vm9, %v2378_v58, %v1532_v6  ;;  %v1539_v54 = vmul.f32 %v2380_v39, %v1538_v20 }
 0x297   : > { %v1671_v14 = vmul.f32 %v1536_v53, %v3225_v21  ;;  %v1672_v45 = vmul.f32 %v1536_v53, %v3228_v48 }
 0x298   : > { %v1540_v35 = vmul.f32 0.5, %v1539_v54  ;;  %v1444_v13 = vpop.xlane.xlu0 %1443 }
 0x299   : > { %v1709_v27 = vmul.f32 %v3386_v8, %v1671_v14  ;;  %v1710_v38 = vmul.f32 %v3388_v9, %v1672_v45  ;;  %v1480_v17 = vmul.f32 %v1444_v13, %v3192_v2 }
 0x29a   : > { %v1541_v1 = vsub.f32 1.5, %v1540_v35 }
 0x29b   : > { %v2382_v61 = vpop.eup %2381  ;;  %v1747_v58 = vadd.f32 %v3390_v16, %v1709_v27  ;;  %v1748_v40 = vadd.f32 %v3392_v32, %v1710_v38  ;;  %v1496_v21 = vadd.f32 1e-05, %v1480_v17 }
 0x29c   : > { %v1542_v3 = vmul.f32 %v2380_v39, %v1541_v1  ;;  %v1548_v48 = vmul.f32 %v2382_v61, %v1495_v19  ;;  %vm1554_vm13 = vweird.f32 %v2382_v61 }
 0x29d   : > { %1779 = vst [vmem:[%s3403_s10 + $0x20] sm:$0xff] %v1747_v58  ;;  %2383 = vrsqrt.f32 %v1496_v21  ;;  %vm1555_vm15 = vmor %vm1553_vm14, %vm1554_vm13  ;;  %vm1563_vm1 = vweird.f32 %v1496_v21 }
 0x29e   : > { %1780 = vst [vmem:[%s3403_s10 + $0x28] sm:$0xff] %v1748_v40  ;;  %v1546_v42 = vsel %vm1545_vm12, %v2380_v39, %v1542_v3  ;;  %v1549_v63 = vmul.f32 %v2382_v61, %v1548_v48 }
 0x29f   : > { %v1673_v55 = vmul.f32 %v1546_v42, %v3236_v46  ;;  %v1674_v57 = vmul.f32 %v1546_v42, %v3239_v15 }
 0x2a0   : > { %v1550_v56 = vmul.f32 0.5, %v1549_v63  ;;  %v1447_v34 = vpop.xlane.xlu1 %1446 }
 0x2a1   : > { %v1711_v26 = vmul.f32 %v3386_v8, %v1673_v55  ;;  %v1712_v11 = vmul.f32 %v3388_v9, %v1674_v57  ;;  %v1481_v25 = vmul.f32 %v1447_v34, %v3192_v2 }
 0x2a2   : > { %v1551_v22 = vsub.f32 1.5, %v1550_v56 }
 0x2a3   : > { %v2384_v51 = vpop.eup %2383  ;;  %v1749_v39 = vadd.f32 %v3390_v16, %v1711_v26  ;;  %v1750_v33 = vadd.f32 %v3392_v32, %v1712_v11  ;;  %v1497_v46 = vadd.f32 1e-05, %v1481_v25 }
 0x2a4   : > { %v1552_v31 = vmul.f32 %v2382_v61, %v1551_v22  ;;  %v1558_v15 = vmul.f32 %v2384_v51, %v1496_v21  ;;  %vm1564_vm0 = vweird.f32 %v2384_v51 }
 0x2a5   : > { %1781 = vst [vmem:[%s3403_s10 + $0x30] sm:$0xff] %v1749_v39  ;;  %2385 = vrsqrt.f32 %v1497_v46  ;;  %vm1565_vm2 = vmor %vm1563_vm1, %vm1564_vm0  ;;  %vm1573_vm4 = vweird.f32 %v1497_v46 }
 0x2a6   : > { %1782 = vst [vmem:[%s3403_s10 + $0x38] sm:$0xff] %v1750_v33  ;;  %v1556_v6 = vsel %vm1555_vm15, %v2382_v61, %v1552_v31  ;;  %v1559_v20 = vmul.f32 %v2384_v51, %v1558_v15 }
 0x2a7   : > { %v1675_v53 = vmul.f32 %v1556_v6, %v3247_v10  ;;  %v1676_v54 = vmul.f32 %v1556_v6, %v3250_v5 }
 0x2a8   : > { %v1560_v14 = vmul.f32 0.5, %v1559_v20  ;;  %v1450_v45 = vpop.xlane.xlu2 %1449 }
 0x2a9   : > { %v1713_v35 = vmul.f32 %v3386_v8, %v1675_v53  ;;  %v1714_v13 = vmul.f32 %v3388_v9, %v1676_v54  ;;  %v1482_v19 = vmul.f32 %v1450_v45, %v3192_v2 }
 0x2aa   : > { %v1561_v27 = vsub.f32 1.5, %v1560_v14 }
 0x2ab   : > { %v2386_v38 = vpop.eup %2385  ;;  %v1751_v17 = vadd.f32 %v3390_v16, %v1713_v35  ;;  %v1752_v1 = vadd.f32 %v3392_v32, %v1714_v13  ;;  %v1498_v10 = vadd.f32 1e-05, %v1482_v19 }
 0x2ac   : > { %v1562_v61 = vmul.f32 %v2384_v51, %v1561_v27  ;;  %v1568_v5 = vmul.f32 %v2386_v38, %v1497_v46  ;;  %vm1574_vm3 = vweird.f32 %v2386_v38 }
 0x2ad   : > { %1783 = vst [vmem:[%s3403_s10 + $0x40] sm:$0xff] %v1751_v17  ;;  %2387 = vrsqrt.f32 %v1498_v10  ;;  %vm1575_vm5 = vmor %vm1573_vm4, %vm1574_vm3  ;;  %vm1583_vm7 = vweird.f32 %v1498_v10 }
 0x2ae   : > { %1784 = vst [vmem:[%s3403_s10 + $0x48] sm:$0xff] %v1752_v1  ;;  %v1566_v58 = vsel %vm1565_vm2, %v2384_v51, %v1562_v61  ;;  %v1569_v40 = vmul.f32 %v2386_v38, %v1568_v5 }
 0x2af   : > { %v1677_v3 = vmul.f32 %v1566_v58, %v3258_v0  ;;  %v1678_v48 = vmul.f32 %v1566_v58, %v3261_v50 }
 0x2b0   : > { %v1570_v42 = vmul.f32 0.5, %v1569_v40  ;;  %v1453_v63 = vpop.xlane.xlu0 %1452 }
 0x2b1   : > { %v1715_v55 = vmul.f32 %v3386_v8, %v1677_v3  ;;  %v1716_v57 = vmul.f32 %v3388_v9, %v1678_v48  ;;  %v1483_v21 = vmul.f32 %v1453_v63, %v3192_v2 }
 0x2b2   : > { %v1571_v56 = vsub.f32 1.5, %v1570_v42 }
 0x2b3   : > { %v2388_v34 = vpop.eup %2387  ;;  %v1753_v26 = vadd.f32 %v3390_v16, %v1715_v55  ;;  %v1754_v11 = vadd.f32 %v3392_v32, %v1716_v57  ;;  %v1499_v0 = vadd.f32 1e-05, %v1483_v21 }
 0x2b4   : > { %v1572_v25 = vmul.f32 %v2386_v38, %v1571_v56  ;;  %v1578_v50 = vmul.f32 %v2388_v34, %v1498_v10  ;;  %vm1584_vm6 = vweird.f32 %v2388_v34 }
 0x2b5   : > { %1785 = vst [vmem:[%s3403_s10 + $0x50] sm:$0xff] %v1753_v26  ;;  %2389 = vrsqrt.f32 %v1499_v0  ;;  %vm1585_vm8 = vmor %vm1583_vm7, %vm1584_vm6  ;;  %vm1593_vm10 = vweird.f32 %v1499_v0 }
 0x2b6   : > { %1786 = vst [vmem:[%s3403_s10 + $0x58] sm:$0xff] %v1754_v11  ;;  %v1576_v22 = vsel %vm1575_vm5, %v2386_v38, %v1572_v25  ;;  %v1579_v51 = vmul.f32 %v2388_v34, %v1578_v50 }
 0x2b7   : > { %v1679_v39 = vmul.f32 %v1576_v22, %v3269_v62  ;;  %v1680_v33 = vmul.f32 %v1576_v22, %v3272_v36 }
 0x2b8   : > { %v1580_v31 = vmul.f32 0.5, %v1579_v51  ;;  %v1456_v15 = vpop.xlane.xlu1 %1455 }
 0x2b9   : > { %v1717_v6 = vmul.f32 %v3386_v8, %v1679_v39  ;;  %v1718_v20 = vmul.f32 %v3388_v9, %v1680_v33  ;;  %v1484_v46 = vmul.f32 %v1456_v15, %v3192_v2 }
 0x2ba   : > { %v1581_v53 = vsub.f32 1.5, %v1580_v31 }
 0x2bb   : > { %v2390_v54 = vpop.eup %2389  ;;  %v1755_v14 = vadd.f32 %v3390_v16, %v1717_v6  ;;  %v1756_v45 = vadd.f32 %v3392_v32, %v1718_v20  ;;  %v1500_v62 = vadd.f32 1e-05, %v1484_v46 }
 0x2bc   : > { %v1582_v35 = vmul.f32 %v2388_v34, %v1581_v53  ;;  %v1588_v36 = vmul.f32 %v2390_v54, %v1499_v0  ;;  %vm1594_vm9 = vweird.f32 %v2390_v54 }
 0x2bd   : > { %1787 = vst [vmem:[%s3403_s10 + $0x60] sm:$0xff] %v1755_v14  ;;  %2391 = vrsqrt.f32 %v1500_v62  ;;  %vm1595_vm11 = vmor %vm1593_vm10, %vm1594_vm9  ;;  %vm1603_vm13 = vweird.f32 %v1500_v62 }
 0x2be   : > { %1788 = vst [vmem:[%s3403_s10 + $0x68] sm:$0xff] %v1756_v45  ;;  %v1586_v13 = vsel %vm1585_vm8, %v2388_v34, %v1582_v35  ;;  %v1589_v19 = vmul.f32 %v2390_v54, %v1588_v36 }
 0x2bf   : > { %v1681_v27 = vmul.f32 %v1586_v13, %v3280_v49  ;;  %v1682_v38 = vmul.f32 %v1586_v13, %v3283_v60 }
 0x2c0   : > { %v1590_v17 = vmul.f32 0.5, %v1589_v19  ;;  %v1459_v1 = vpop.xlane.xlu2 %1458 }
 0x2c1   : > { %v1719_v61 = vmul.f32 %v3386_v8, %v1681_v27  ;;  %v1720_v5 = vmul.f32 %v3388_v9, %v1682_v38  ;;  %v1485_v10 = vmul.f32 %v1459_v1, %v3192_v2 }
 0x2c2   : > { %v1591_v58 = vsub.f32 1.5, %v1590_v17 }
 0x2c3   : > { %v2392_v40 = vpop.eup %2391  ;;  %v1757_v3 = vadd.f32 %v3390_v16, %v1719_v61  ;;  %v1758_v48 = vadd.f32 %v3392_v32, %v1720_v5  ;;  %v1501_v49 = vadd.f32 1e-05, %v1485_v10 }
 0x2c4   : > { %v1592_v42 = vmul.f32 %v2390_v54, %v1591_v58  ;;  %v1598_v60 = vmul.f32 %v2392_v40, %v1500_v62  ;;  %vm1604_vm12 = vweird.f32 %v2392_v40 }
 0x2c5   : > { %1789 = vst [vmem:[%s3403_s10 + $0x70] sm:$0xff] %v1757_v3  ;;  %2393 = vrsqrt.f32 %v1501_v49  ;;  %vm1605_vm14 = vmor %vm1603_vm13, %vm1604_vm12  ;;  %vm1613_vm0 = vweird.f32 %v1501_v49 }
 0x2c6   : > { %1790 = vst [vmem:[%s3403_s10 + $0x78] sm:$0xff] %v1758_v48  ;;  %v1596_v63 = vsel %vm1595_vm11, %v2390_v54, %v1592_v42  ;;  %v1599_v55 = vmul.f32 %v2392_v40, %v1598_v60 }
 0x2c7   : > { %v1683_v57 = vmul.f32 %v1596_v63, %v3291_v29  ;;  %v1684_v21 = vmul.f32 %v1596_v63, %v3294_v4 }
 0x2c8   : > { %v1600_v56 = vmul.f32 0.5, %v1599_v55  ;;  %v1462_v34 = vpop.xlane.xlu0 %1461 }
 0x2c9   : > { %v1721_v26 = vmul.f32 %v3386_v8, %v1683_v57  ;;  %v1722_v11 = vmul.f32 %v3388_v9, %v1684_v21  ;;  %v1486_v0 = vmul.f32 %v1462_v34, %v3192_v2 }
 0x2ca   : > { %v1601_v25 = vsub.f32 1.5, %v1600_v56 }
 0x2cb   : > { %v2394_v50 = vpop.eup %2393  ;;  %v1759_v22 = vadd.f32 %v3390_v16, %v1721_v26  ;;  %v1760_v51 = vadd.f32 %v3392_v32, %v1722_v11  ;;  %v1502_v29 = vadd.f32 1e-05, %v1486_v0 }
 0x2cc   : > { %v1602_v39 = vmul.f32 %v2392_v40, %v1601_v25  ;;  %v1608_v4 = vmul.f32 %v2394_v50, %v1501_v49  ;;  %vm1614_vm15 = vweird.f32 %v2394_v50 }
 0x2cd   : > { %1791 = vst [vmem:[%s3403_s10 + $0x80] sm:$0xff] %v1759_v22  ;;  %2395 = vrsqrt.f32 %v1502_v29  ;;  %vm1615_vm1 = vmor %vm1613_vm0, %vm1614_vm15  ;;  %vm1623_vm3 = vweird.f32 %v1502_v29 }
 0x2ce   : > { %1792 = vst [vmem:[%s3403_s10 + $0x88] sm:$0xff] %v1760_v51  ;;  %v1606_v33 = vsel %vm1605_vm14, %v2392_v40, %v1602_v39  ;;  %v1609_v31 = vmul.f32 %v2394_v50, %v1608_v4 }
 0x2cf   : > { %v1685_v15 = vmul.f32 %v1606_v33, %v3302_v12  ;;  %v1686_v6 = vmul.f32 %v1606_v33, %v3305_v30 }
 0x2d0   : > { %v1610_v20 = vmul.f32 0.5, %v1609_v31  ;;  %v1465_v46 = vpop.xlane.xlu1 %1464 }
 0x2d1   : > { %v1723_v53 = vmul.f32 %v3386_v8, %v1685_v15  ;;  %v1724_v54 = vmul.f32 %v3388_v9, %v1686_v6  ;;  %v1487_v14 = vmul.f32 %v1465_v46, %v3192_v2 }
 0x2d2   : > { %v1611_v45 = vsub.f32 1.5, %v1610_v20 }
 0x2d3   : > { %v2396_v62 = vpop.eup %2395  ;;  %v1761_v35 = vadd.f32 %v3390_v16, %v1723_v53  ;;  %v1762_v36 = vadd.f32 %v3392_v32, %v1724_v54  ;;  %v1503_v12 = vadd.f32 1e-05, %v1487_v14 }
 0x2d4   : > { %v1612_v13 = vmul.f32 %v2394_v50, %v1611_v45  ;;  %v1618_v30 = vmul.f32 %v2396_v62, %v1502_v29  ;;  %vm1624_vm2 = vweird.f32 %v2396_v62 }
 0x2d5   : > { %1793 = vst [vmem:[%s3403_s10 + $0x90] sm:$0xff] %v1761_v35  ;;  %2397 = vrsqrt.f32 %v1503_v12  ;;  %vm1625_vm4 = vmor %vm1623_vm3, %vm1624_vm2  ;;  %vm1633_vm6 = vweird.f32 %v1503_v12 }
 0x2d6   : > { %1794 = vst [vmem:[%s3403_s10 + $0x98] sm:$0xff] %v1762_v36  ;;  %v1616_v19 = vsel %vm1615_vm1, %v2394_v50, %v1612_v13  ;;  %v1619_v27 = vmul.f32 %v2396_v62, %v1618_v30 }
 0x2d7   : > { %v1687_v38 = vmul.f32 %v1616_v19, %v3313_v47  ;;  %v1688_v17 = vmul.f32 %v1616_v19, %v3316_v37 }
 0x2d8   : > { %v1620_v1 = vmul.f32 0.5, %v1619_v27  ;;  %v1468_v61 = vpop.xlane.xlu2 %1467 }
 0x2d9   : > { %v1725_v5 = vmul.f32 %v3386_v8, %v1687_v38  ;;  %v1726_v10 = vmul.f32 %v3388_v9, %v1688_v17  ;;  %v1488_v58 = vmul.f32 %v1468_v61, %v3192_v2 }
 0x2da   : > { %v1621_v40 = vsub.f32 1.5, %v1620_v1 }
 0x2db   : > { %v2398_v3 = vpop.eup %2397  ;;  %v1763_v48 = vadd.f32 %v3390_v16, %v1725_v5  ;;  %v1764_v49 = vadd.f32 %v3392_v32, %v1726_v10  ;;  %v1504_v47 = vadd.f32 1e-05, %v1488_v58 }
 0x2dc   : > { %v1622_v42 = vmul.f32 %v2396_v62, %v1621_v40  ;;  %v1628_v37 = vmul.f32 %v2398_v3, %v1503_v12  ;;  %vm1634_vm5 = vweird.f32 %v2398_v3 }
 0x2dd   : > { %1795 = vst [vmem:[%s3403_s10 + $0xa0] sm:$0xff] %v1763_v48  ;;  %2399 = vrsqrt.f32 %v1504_v47  ;;  %vm1635_vm7 = vmor %vm1633_vm6, %vm1634_vm5  ;;  %vm1643_vm9 = vweird.f32 %v1504_v47 }
 0x2de   : > { %1796 = vst [vmem:[%s3403_s10 + $0xa8] sm:$0xff] %v1764_v49  ;;  %v1626_v60 = vsel %vm1625_vm4, %v2396_v62, %v1622_v42  ;;  %v1629_v63 = vmul.f32 %v2398_v3, %v1628_v37 }
 0x2df   : > { %v1689_v55 = vmul.f32 %v1626_v60, %v3324_v59  ;;  %v1690_v57 = vmul.f32 %v1626_v60, %v3327_v41 }
 0x2e0   : > { %v1630_v21 = vmul.f32 0.5, %v1629_v63  ;;  %v1471_v56 = vpop.xlane.xlu0 %1470 }
 0x2e1   : > { %v1727_v34 = vmul.f32 %v3386_v8, %v1689_v55  ;;  %v1728_v26 = vmul.f32 %v3388_v9, %v1690_v57  ;;  %v1489_v11 = vmul.f32 %v1471_v56, %v3192_v2 }
 0x2e2   : > { %v1631_v0 = vsub.f32 1.5, %v1630_v21 }
 0x2e3   : > { %v2400_v25 = vpop.eup %2399  ;;  %v1765_v50 = vadd.f32 %v3390_v16, %v1727_v34  ;;  %v1766_v22 = vadd.f32 %v3392_v32, %v1728_v26  ;;  %v1505_v59 = vadd.f32 1e-05, %v1489_v11 }
 0x2e4   : > { %v1632_v51 = vmul.f32 %v2398_v3, %v1631_v0  ;;  %v1638_v41 = vmul.f32 %v2400_v25, %v1504_v47  ;;  %vm1644_vm8 = vweird.f32 %v2400_v25 }
 0x2e5   : > { %1797 = vst [vmem:[%s3403_s10 + $0xb0] sm:$0xff] %v1765_v50  ;;  %2401 = vrsqrt.f32 %v1505_v59  ;;  %vm1645_vm10 = vmor %vm1643_vm9, %vm1644_vm8  ;;  %vm1653_vm12 = vweird.f32 %v1505_v59 }
 0x2e6   : > { %1798 = vst [vmem:[%s3403_s10 + $0xb8] sm:$0xff] %v1766_v22  ;;  %v1636_v29 = vsel %vm1635_vm7, %v2398_v3, %v1632_v51  ;;  %v1639_v39 = vmul.f32 %v2400_v25, %v1638_v41 }
 0x2e7   : > { %v1691_v4 = vmul.f32 %v1636_v29, %v3335_v43  ;;  %v1692_v33 = vmul.f32 %v1636_v29, %v3338_v52 }
 0x2e8   : > { %v1640_v31 = vmul.f32 0.5, %v1639_v39  ;;  %v1474_v15 = vpop.xlane.xlu1 %1473 }
 0x2e9   : > { %v1729_v6 = vmul.f32 %v3386_v8, %v1691_v4  ;;  %v1730_v20 = vmul.f32 %v3388_v9, %v1692_v33  ;;  %v1490_v46 = vmul.f32 %v1474_v15, %v3192_v2 }
 0x2ea   : > { %v1641_v53 = vsub.f32 1.5, %v1640_v31 }
 0x2eb   : > { %v2402_v54 = vpop.eup %2401  ;;  %v1767_v14 = vadd.f32 %v3390_v16, %v1729_v6  ;;  %v1768_v45 = vadd.f32 %v3392_v32, %v1730_v20  ;;  %v1506_v43 = vadd.f32 1e-05, %v1490_v46 }
 0x2ec   : > { %v1642_v62 = vmul.f32 %v2400_v25, %v1641_v53  ;;  %v1648_v52 = vmul.f32 %v2402_v54, %v1505_v59  ;;  %vm1654_vm11 = vweird.f32 %v2402_v54 }
 0x2ed   : > { %1799 = vst [vmem:[%s3403_s10 + $0xc0] sm:$0xff] %v1767_v14  ;;  %2403 = vrsqrt.f32 %v1506_v43  ;;  %vm1655_vm13 = vmor %vm1653_vm12, %vm1654_vm11  ;;  %vm1663_vm15 = vweird.f32 %v1506_v43 }
 0x2ee   : > { %1800 = vst [vmem:[%s3403_s10 + $0xc8] sm:$0xff] %v1768_v45  ;;  %v1646_v35 = vsel %vm1645_vm10, %v2400_v25, %v1642_v62  ;;  %v1649_v36 = vmul.f32 %v2402_v54, %v1648_v52 }
 0x2ef   : > { %v1693_v2 = vmul.f32 %v1646_v35, %v3346_v23  ;;  %v1694_v12 = vmul.f32 %v1646_v35, %v3349_v24 }
 0x2f0   : > { %v1650_v13 = vmul.f32 0.5, %v1649_v36 }
 0x2f1   : > { %v1731_v30 = vmul.f32 %v3386_v8, %v1693_v2  ;;  %v1732_v19 = vmul.f32 %v3388_v9, %v1694_v12 }
 0x2f2   : > { %v1651_v27 = vsub.f32 1.5, %v1650_v13 }
 0x2f3   : > { %v2404_v38 = vpop.eup %2403  ;;  %v1769_v17 = vadd.f32 %v3390_v16, %v1731_v30  ;;  %v1770_v1 = vadd.f32 %v3392_v32, %v1732_v19 }
 0x2f4   : > { %v1652_v61 = vmul.f32 %v2402_v54, %v1651_v27  ;;  %v1658_v5 = vmul.f32 %v2404_v38, %v1506_v43  ;;  %vm1664_vm14 = vweird.f32 %v2404_v38 }
 0x2f5   : > { %1801 = vst [vmem:[%s3403_s10 + $0xd0] sm:$0xff] %v1769_v17  ;;  %vm1665_vm0 = vmor %vm1663_vm15, %vm1664_vm14 }
 0x2f6   : > { %1802 = vst [vmem:[%s3403_s10 + $0xd8] sm:$0xff] %v1770_v1  ;;  %v1656_v23 = vsel %vm1655_vm13, %v2402_v54, %v1652_v61  ;;  %v1659_v24 = vmul.f32 %v2404_v38, %v1658_v5 }
 0x2f7   : > { %v1695_v10 = vmul.f32 %v1656_v23, %v3357_v28  ;;  %v1696_v58 = vmul.f32 %v1656_v23, %v3360_v7 }
 0x2f8   : > { %v1660_v40 = vmul.f32 0.5, %v1659_v24 }
 0x2f9   : > { %v1733_v3 = vmul.f32 %v3386_v8, %v1695_v10  ;;  %v1734_v48 = vmul.f32 %v3388_v9, %v1696_v58 }
 0x2fa   : > { %v1661_v49 = vsub.f32 1.5, %v1660_v40 }
 0x2fb   : > { %v1771_v47 = vadd.f32 %v3390_v16, %v1733_v3  ;;  %v1772_v42 = vadd.f32 %v3392_v32, %v1734_v48 }
 0x2fc   : > { %v1662_v37 = vmul.f32 %v2404_v38, %v1661_v49 }
 0x2fd   : > { %1803 = vst [vmem:[%s3403_s10 + $0xe0] sm:$0xff] %v1771_v47 }
 0x2fe   : > { %1804 = vst [vmem:[%s3403_s10 + $0xe8] sm:$0xff] %v1772_v42  ;;  %v1666_v28 = vsel %vm1665_vm0, %v2404_v38, %v1662_v37 }
 0x2ff   : > { %v1697_v7 = vmul.f32 %v1666_v28, %v3368_v44  ;;  %v1698_v60 = vmul.f32 %v1666_v28, %v3371_v18 }
 0x301   : > { %v1735_v63 = vmul.f32 %v3386_v8, %v1697_v7  ;;  %v1736_v55 = vmul.f32 %v3388_v9, %v1698_v60 }
 0x303   : > { %v1773_v57 = vadd.f32 %v3390_v16, %v1735_v63  ;;  %v1774_v21 = vadd.f32 %v3392_v32, %v1736_v55 }
 0x305   : > { %1805 = vst [vmem:[%s3403_s10 + $0xf0] sm:$0xff] %v1773_v57 }
 0x306   : > { %1806 = vst [vmem:[%s3403_s10 + $0xf8] sm:$0xff] %v1774_v21 }
 0x307   : > { %2552 = shalt.err (!%p2549_p9)
}
 0x308   : > { %s2610_s13 = smov 256   ;;  %s2611_s9 = smov 16  }
 0x309   : > { %2302 = dma.vmem_to_hbm [thread:$0]  (%p2713_p3), %s1822_s25, 4096, %s1824_s29, %s1808_s17, %s2610_s13, %s2610_s13, %s2611_s9  }
 0x30a PF: > { %s1838_s27 = sand.u32 1, %s2587_s21   ;;  %p3594_p12 = scmp.ge.s32.totalorder %s2599_s24, 2 }
 0x30b   : > { %s1839_s11 = scalar_lea.sflag [#allocation4], %s1838_s27 }
 0x30c   : > { %p2319_p13 = pnand %p3594_p12, %p2682_p6 }
 0x30e   : > { %p2320_p0 = pneg %p2319_p13 }
 0x310   : > { %2582 = dma.done.wait (%p2320_p0), %s1839_s11, 4096  }
 0x311   : > { %2584 = vsyncadd (%p2320_p0), %s1839_s11, 4294963200  ;;  %s3595_s19 = sld [smem:[#allocation15_spill]]  ;;  %p23_p5 = scmp.ge.s32.totalorder %s2703_s18, 4  }
 0x312   : > { %s3596_s23 = sld [smem:[#allocation16_spill]]  ;;  %s3597_s21 = smov %s2591_s22 }
 0x313   : > { %s3599_s24 = smov %s2703_s18  ;;  %25 = sbr.rel (!%p23_p5) target bundleno = 12 (0xc), region = 110 }
 0x317   : > { %s3598_s22 = smov %s3595_s19 }
 0x318   :  { %1845 = vsyncpa [#allocation3], 1 }
 0x319   :  { %1847 = vsyncpa [#allocation3 + $0x1], 1 }
 0x31a   :  { %1848 = vsyncpa [#allocation6], 1 }
 0x31b   :  { %1849 = vsyncpa [#allocation9], 1 }
 0x31c   :  { %1851 = vsyncpa [#allocation9 + $0x1], 1 }
 0x31d   :  { %1852 = vsyncpa [#allocation4], 1 }
 0x31e   :  { %1854 = vsyncpa [#allocation4 + $0x1], 1 }

</bundles_post_ra>
